<compile_context>
chip_gen: v5e
topology: v5e:2x2
jax: 0.10.0
libtpu: 0.0.40
codegen_flags: <defaults>
</compile_context>

<pallas_src>
import functools

import jax
import jax.numpy as jnp
import numpy as np
from jax.experimental import pallas as pl
from jax.experimental.pallas import tpu as pltpu


def _axis_weights(start, bin_size, P, G, size):
    """Accumulated bilinear weights along one axis, vectorized over ROIs.

    start, bin_size: (N,) float32.  Returns (N, P, size) float32: weight of pixel `i`
    for output bin `p`, summed over the G sample points of that bin (boundary /
    clamping semantics match the CUDA roi_align_forward kernel, aligned=False).
    """
    n = start.shape[0]
    start = start.astype(jnp.float32)[:, None, None]          # (N,1,1)
    bin_size = bin_size.astype(jnp.float32)[:, None, None]    # (N,1,1)
    p_idx = jnp.arange(P, dtype=jnp.float32)[None, :, None]   # (1,P,1)
    pix = jnp.arange(size, dtype=jnp.float32)[None, None, :]  # (1,1,size)
    fsize = float(size)
    acc = jnp.zeros((n, P, size), jnp.float32)
    for g in range(G):  # G small & static -> unrolled
        coord = start + p_idx * bin_size + (g + 0.5) * bin_size / G
        valid = ((coord >= -1.0) & (coord <= fsize)).astype(jnp.float32)
        c = jnp.maximum(coord, 0.0)
        low = jnp.floor(c)
        at_edge = low >= (fsize - 1.0)
        low = jnp.where(at_edge, fsize - 1.0, low)
        high = jnp.where(at_edge, low, low + 1.0)
        c = jnp.where(at_edge, low, c)
        l = c - low
        h = 1.0 - l
        w = (h * (pix == low).astype(jnp.float32)
             + l * (pix == high).astype(jnp.float32))
        acc = acc + w * valid
    return acc


def _roi_align_kernel(bids_ref, wy_ref, wx_ref, feat_ref, out_ref, *, PH, PW, W, C):
    """One ROI per grid step.

    wy_ref:   (1, PH, H)   per-ROI row weights (1/count folded in)
    wx_ref:   (1, PW, W)   per-ROI column weights
    feat_ref: (1, H, W*C)  this ROI's image, NHWC flattened (lane-dense in C)
    out_ref:  (1, PH, PW, C) lane-dense C-last output block
    """
    del bids_ref  # consumed by the feature index_map only
    wy = wy_ref[0]                              # (PH, H)
    wx = wx_ref[0].astype(jnp.float32)          # (PW, W)
    f2 = feat_ref[0]                            # (H, W*C)

    # Stage 1: channel-fused MXU matmul over H (the dominant compute).
    t = jnp.dot(wy, f2, preferred_element_type=jnp.float32)   # (PH, W*C) f32

    # Stage 2: small W-contraction as static outer-product MACs on the VPU.
    # out[ph, pw, c] = sum_w wx[pw, w] * t[ph, w*C + c]
    # TODO(synk): for very large W, switch this to a fori_loop / MXU path.
    for ph in range(PH):
        acc = jnp.zeros((PW, C), jnp.float32)
        for w in range(W):
            acc = acc + wx[:, w:w + 1] * t[ph:ph + 1, w * C:(w + 1) * C]
        out_ref[0, ph] = acc.astype(out_ref.dtype)


def roi_align_forward(features, rois, output_size, spatial_scale, sampling_ratio):
    """Pallas TPU ROIAlign forward.

    features: (B, C, H, W) float32/bfloat16 (NCHW)
    rois:     (N, 5) float32, each row (batch_idx, x1, y1, x2, y2)
    returns:  (N, C, PH, PW) in features.dtype
    """
    # TODO(synk): sampling_ratio <= 0 (adaptive, roi-dependent grid) needs a dynamic
    # per-roi trip count; only the fixed sampling_ratio > 0 path is implemented.
    assert sampling_ratio > 0, "only sampling_ratio > 0 supported"
    B, C, H, W = features.shape
    N = rois.shape[0]
    PH, PW = output_size
    G = int(sampling_ratio)

    # Clamp batch ids (robustness) and sort ROIs by image so consecutive grid steps
    # reuse the resident feature block (Pallas skips the DMA when the block index
    # repeats).  Un-permute the output afterwards.
    batch_ids = jnp.clip(rois[:, 0].astype(jnp.int32), 0, B - 1)
    order = jnp.argsort(batch_ids)
    inv_order = jnp.argsort(order)
    batch_ids_s = batch_ids[order]
    rois_s = rois[order]

    # Precompute per-ROI separable weights (plain JAX, vectorized over N).
    scale = jnp.float32(spatial_scale)
    roi_start_w = rois_s[:, 1] * scale
    roi_start_h = rois_s[:, 2] * scale
    roi_end_w = rois_s[:, 3] * scale
    roi_end_h = rois_s[:, 4] * scale
    roi_w = jnp.maximum(roi_end_w - roi_start_w, 1.0)
    roi_h = jnp.maximum(roi_end_h - roi_start_h, 1.0)
    bin_h = roi_h / PH
    bin_w = roi_w / PW
    inv_count = 1.0 / float(G * G)

    wy = _axis_weights(roi_start_h, bin_h, PH, G, H) * inv_count   # (N, PH, H)
    wx = _axis_weights(roi_start_w, bin_w, PW, G, W)               # (N, PW, W)

    # Keep bf16 features bf16 (MXU takes bf16 natively with f32 accumulation).
    w_dtype = features.dtype if features.dtype == jnp.bfloat16 else jnp.float32
    wy = wy.astype(w_dtype)
    wx = wx.astype(w_dtype)

    # Lane-dense NHWC-flat features: (B, H, W*C).  Layout plumbing stays in the wrapper.
    feats = jnp.transpose(features, (0, 2, 3, 1)).reshape(B, H, W * C)

    kernel = functools.partial(_roi_align_kernel, PH=PH, PW=PW, W=W, C=C)

    # Size the scoped VMEM limit from the (double-buffered) blocks, with headroom.
    fbytes = np.dtype(features.dtype).itemsize
    wbytes = np.dtype(w_dtype).itemsize
    need = 2 * (H * W * C * fbytes + PH * H * wbytes + PW * W * wbytes
                + PH * PW * C * fbytes) + (4 << 20)
    vmem_limit = int(min(max(need, 32 << 20), 100 << 20))

    grid_spec = pltpu.PrefetchScalarGridSpec(
        num_scalar_prefetch=1,           # batch_ids -> SMEM, used by the feature index_map
        grid=(N,),
        in_specs=[
            pl.BlockSpec((1, PH, H), lambda n, bids: (n, 0, 0)),            # Wy
            pl.BlockSpec((1, PW, W), lambda n, bids: (n, 0, 0)),            # Wx
            pl.BlockSpec((1, H, W * C), lambda n, bids: (bids[n], 0, 0)),   # image
        ],
        out_specs=pl.BlockSpec((1, PH, PW, C), lambda n, bids: (n, 0, 0, 0)),
    )

    out_sorted = pl.pallas_call(
        kernel,
        out_shape=jax.ShapeDtypeStruct((N, PH, PW, C), features.dtype),
        grid_spec=grid_spec,
        compiler_params=pltpu.CompilerParams(
            dimension_semantics=("parallel",),   # disjoint output blocks -> v7x 2-TC split
            vmem_limit_bytes=vmem_limit,
        ),
    )(batch_ids_s, wy, wx, feats)

    out = out_sorted[inv_order]                   # undo the sort
    return jnp.transpose(out, (0, 3, 1, 2))       # (N, PH, PW, C) -> (N, C, PH, PW)


def roi_align_ref(features, rois, output_size, spatial_scale, sampling_ratio):
    """Pure numpy reference matching the CUDA roi_align_forward (aligned=False)."""
    feats = np.asarray(features, dtype=np.float32)
    r = np.asarray(rois, dtype=np.float32)
    B, C, H, W = feats.shape
    PH, PW = output_size
    N = r.shape[0]
    out = np.zeros((N, C, PH, PW), np.float32)
    for n in range(N):
        b = int(r[n, 0])
        sw = np.float32(r[n, 1] * spatial_scale)
        sh = np.float32(r[n, 2] * spatial_scale)
        ew = np.float32(r[n, 3] * spatial_scale)
        eh = np.float32(r[n, 4] * spatial_scale)
        rw = max(np.float32(ew - sw), np.float32(1.0))
        rh = max(np.float32(eh - sh), np.float32(1.0))
        bh = np.float32(rh / PH)
        bw = np.float32(rw / PW)
        gh = gw = sampling_ratio
        for ph in range(PH):
            for pw in range(PW):
                acc = np.zeros(C, np.float32)
                for iy in range(gh):
                    y = np.float32(sh + ph * bh + (iy + 0.5) * bh / gh)
                    for ix in range(gw):
                        x = np.float32(sw + pw * bw + (ix + 0.5) * bw / gw)
                        if y < -1.0 or y > H or x < -1.0 or x > W:
                            continue
                        yy = max(np.float32(y), np.float32(0.0))
                        xx = max(np.float32(x), np.float32(0.0))
                        y_low = int(np.floor(yy))
                        x_low = int(np.floor(xx))
                        if y_low >= H - 1:
                            y_high = y_low = H - 1
                            yy = np.float32(y_low)
                        else:
                            y_high = y_low + 1
                        if x_low >= W - 1:
                            x_high = x_low = W - 1
                            xx = np.float32(x_low)
                        else:
                            x_high = x_low + 1
                        ly = yy - y_low
                        lx = xx - x_low
                        hy = 1.0 - ly
                        hx = 1.0 - lx
                        acc += (hy * hx * feats[b, :, y_low, x_low]
                                + hy * lx * feats[b, :, y_low, x_high]
                                + ly * hx * feats[b, :, y_high, x_low]
                                + ly * lx * feats[b, :, y_high, x_high]).astype(np.float32)
                out[n, :, ph, pw] = acc / (gh * gw)
    return out


if __name__ == "__main__":
    # ROIAlign has no learned parameters; only hyperparameters:
    output_size = (4, 4)
    spatial_scale = 0.5       # feature map is 1/2 resolution of the image
    sampling_ratio = 2

    key = jax.random.PRNGKey(0)
    kf, kr = jax.random.split(key)

    B, C, H, W = 2, 8, 16, 16
    features = jax.random.normal(kf, (B, C, H, W), dtype=jnp.float32)

    N = 6
    pts = jax.random.uniform(kr, (N, 4), minval=0.0, maxval=31.0, dtype=jnp.float32)
    x1 = jnp.minimum(pts[:, 0], pts[:, 2])
    x2 = jnp.maximum(pts[:, 0], pts[:, 2])
    y1 = jnp.minimum(pts[:, 1], pts[:, 3])
    y2 = jnp.maximum(pts[:, 1], pts[:, 3])
    batch_idx = jnp.array([0, 1, 0, 1, 0, 1], dtype=jnp.float32)
    rois = jnp.stack([batch_idx, x1, y1, x2, y2], axis=1)   # (N, 5)

    out = roi_align_forward(features, rois, output_size, spatial_scale, sampling_ratio)
    out = jax.block_until_ready(out)

    ref = roi_align_ref(features, rois, output_size, spatial_scale, sampling_ratio)
    np.testing.assert_allclose(np.asarray(out), ref, rtol=1e-4, atol=1e-4)

    print("KERNEL_OK")
</pallas_src>

<mosaic_0001>
module attributes {stable_mosaic.version = 11 : i64} {
  func.func @_roi_align_kernel(%arg0: i32, %arg1: memref<6xi32, #tpu.memory_space<smem>>, %arg2: memref<1x4x16xf32, #tpu.memory_space<vmem>>, %arg3: memref<1x4x16xf32, #tpu.memory_space<vmem>>, %arg4: memref<1x16x128xf32, #tpu.memory_space<vmem>>, %arg5: memref<1x4x4x8xf32, #tpu.memory_space<vmem>>) attributes {dimension_semantics = [#tpu.dimension_semantics<parallel>], iteration_bounds = array<i64: 6>, scalar_prefetch = 1 : i64, scratch_operands = 0 : i64, tpu.core_type = #tpu.core_type<tc>, window_params = [{transform_indices = @transform_0, window_bounds = array<i64: 1, 4, 16>}, {transform_indices = @transform_1, window_bounds = array<i64: 1, 4, 16>}, {transform_indices = @transform_2, window_bounds = array<i64: 1, 16, 128>}, {transform_indices = @transform_3, window_bounds = array<i64: 1, 4, 4, 8>}]} {
    %c0 = arith.constant 0 : index
    %c0_0 = arith.constant 0 : index
    %c0_1 = arith.constant 0 : index
    %0 = vector.load %arg2[%c0, %c0_0, %c0_1] : memref<1x4x16xf32, #tpu.memory_space<vmem>>, vector<1x4x16xf32>
    %1 = vector.shape_cast %0 : vector<1x4x16xf32> to vector<4x16xf32>
    %c0_2 = arith.constant 0 : index
    %c0_3 = arith.constant 0 : index
    %c0_4 = arith.constant 0 : index
    %2 = vector.load %arg3[%c0_2, %c0_3, %c0_4] : memref<1x4x16xf32, #tpu.memory_space<vmem>>, vector<1x4x16xf32>
    %3 = vector.shape_cast %2 : vector<1x4x16xf32> to vector<4x16xf32>
    %c0_5 = arith.constant 0 : index
    %c0_6 = arith.constant 0 : index
    %c0_7 = arith.constant 0 : index
    %4 = vector.load %arg4[%c0_5, %c0_6, %c0_7] : memref<1x16x128xf32, #tpu.memory_space<vmem>>, vector<1x16x128xf32>
    %5 = vector.shape_cast %4 : vector<1x16x128xf32> to vector<16x128xf32>
    %cst = arith.constant dense<0.000000e+00> : vector<4x128xf32>
    %6 = tpu.matmul %1, %5, %cst {dimension_numbers = #tpu.dot_dimension_numbers<[1], [0], [0], [1], [0, 0, 1, 1], [], []>} : vector<4x16xf32>, vector<16x128xf32>, vector<4x128xf32> -> vector<4x128xf32>
    %cst_8 = arith.constant 0.000000e+00 : f32
    %7 = vector.broadcast %cst_8 : f32 to vector<4x8xf32>
    %8 = vector.extract_strided_slice %3 {offsets = [0, 0], sizes = [4, 1], strides = [1, 1]} : vector<4x16xf32> to vector<4x1xf32>
    %9 = vector.extract_strided_slice %6 {offsets = [0, 0], sizes = [1, 8], strides = [1, 1]} : vector<4x128xf32> to vector<1x8xf32>
    %10 = vector.broadcast %8 : vector<4x1xf32> to vector<4x8xf32>
    %11 = vector.broadcast %9 : vector<1x8xf32> to vector<4x8xf32>
    %12 = arith.mulf %10, %11 : vector<4x8xf32>
    %13 = arith.addf %7, %12 : vector<4x8xf32>
    %14 = vector.extract_strided_slice %3 {offsets = [0, 1], sizes = [4, 1], strides = [1, 1]} : vector<4x16xf32> to vector<4x1xf32>
    %15 = vector.extract_strided_slice %6 {offsets = [0, 8], sizes = [1, 8], strides = [1, 1]} : vector<4x128xf32> to vector<1x8xf32>
    %16 = vector.broadcast %14 : vector<4x1xf32> to vector<4x8xf32>
    %17 = vector.broadcast %15 : vector<1x8xf32> to vector<4x8xf32>
    %18 = arith.mulf %16, %17 : vector<4x8xf32>
    %19 = arith.addf %13, %18 : vector<4x8xf32>
    %20 = vector.extract_strided_slice %3 {offsets = [0, 2], sizes = [4, 1], strides = [1, 1]} : vector<4x16xf32> to vector<4x1xf32>
    %21 = vector.extract_strided_slice %6 {offsets = [0, 16], sizes = [1, 8], strides = [1, 1]} : vector<4x128xf32> to vector<1x8xf32>
    %22 = vector.broadcast %20 : vector<4x1xf32> to vector<4x8xf32>
    %23 = vector.broadcast %21 : vector<1x8xf32> to vector<4x8xf32>
    %24 = arith.mulf %22, %23 : vector<4x8xf32>
    %25 = arith.addf %19, %24 : vector<4x8xf32>
    %26 = vector.extract_strided_slice %3 {offsets = [0, 3], sizes = [4, 1], strides = [1, 1]} : vector<4x16xf32> to vector<4x1xf32>
    %27 = vector.extract_strided_slice %6 {offsets = [0, 24], sizes = [1, 8], strides = [1, 1]} : vector<4x128xf32> to vector<1x8xf32>
    %28 = vector.broadcast %26 : vector<4x1xf32> to vector<4x8xf32>
    %29 = vector.broadcast %27 : vector<1x8xf32> to vector<4x8xf32>
    %30 = arith.mulf %28, %29 : vector<4x8xf32>
    %31 = arith.addf %25, %30 : vector<4x8xf32>
    %32 = vector.extract_strided_slice %3 {offsets = [0, 4], sizes = [4, 1], strides = [1, 1]} : vector<4x16xf32> to vector<4x1xf32>
    %33 = vector.extract_strided_slice %6 {offsets = [0, 32], sizes = [1, 8], strides = [1, 1]} : vector<4x128xf32> to vector<1x8xf32>
    %34 = vector.broadcast %32 : vector<4x1xf32> to vector<4x8xf32>
    %35 = vector.broadcast %33 : vector<1x8xf32> to vector<4x8xf32>
    %36 = arith.mulf %34, %35 : vector<4x8xf32>
    %37 = arith.addf %31, %36 : vector<4x8xf32>
    %38 = vector.extract_strided_slice %3 {offsets = [0, 5], sizes = [4, 1], strides = [1, 1]} : vector<4x16xf32> to vector<4x1xf32>
    %39 = vector.extract_strided_slice %6 {offsets = [0, 40], sizes = [1, 8], strides = [1, 1]} : vector<4x128xf32> to vector<1x8xf32>
    %40 = vector.broadcast %38 : vector<4x1xf32> to vector<4x8xf32>
    %41 = vector.broadcast %39 : vector<1x8xf32> to vector<4x8xf32>
    %42 = arith.mulf %40, %41 : vector<4x8xf32>
    %43 = arith.addf %37, %42 : vector<4x8xf32>
    %44 = vector.extract_strided_slice %3 {offsets = [0, 6], sizes = [4, 1], strides = [1, 1]} : vector<4x16xf32> to vector<4x1xf32>
    %45 = vector.extract_strided_slice %6 {offsets = [0, 48], sizes = [1, 8], strides = [1, 1]} : vector<4x128xf32> to vector<1x8xf32>
    %46 = vector.broadcast %44 : vector<4x1xf32> to vector<4x8xf32>
    %47 = vector.broadcast %45 : vector<1x8xf32> to vector<4x8xf32>
    %48 = arith.mulf %46, %47 : vector<4x8xf32>
    %49 = arith.addf %43, %48 : vector<4x8xf32>
    %50 = vector.extract_strided_slice %3 {offsets = [0, 7], sizes = [4, 1], strides = [1, 1]} : vector<4x16xf32> to vector<4x1xf32>
    %51 = vector.extract_strided_slice %6 {offsets = [0, 56], sizes = [1, 8], strides = [1, 1]} : vector<4x128xf32> to vector<1x8xf32>
    %52 = vector.broadcast %50 : vector<4x1xf32> to vector<4x8xf32>
    %53 = vector.broadcast %51 : vector<1x8xf32> to vector<4x8xf32>
    %54 = arith.mulf %52, %53 : vector<4x8xf32>
    %55 = arith.addf %49, %54 : vector<4x8xf32>
    %56 = vector.extract_strided_slice %3 {offsets = [0, 8], sizes = [4, 1], strides = [1, 1]} : vector<4x16xf32> to vector<4x1xf32>
    %57 = vector.extract_strided_slice %6 {offsets = [0, 64], sizes = [1, 8], strides = [1, 1]} : vector<4x128xf32> to vector<1x8xf32>
    %58 = vector.broadcast %56 : vector<4x1xf32> to vector<4x8xf32>
    %59 = vector.broadcast %57 : vector<1x8xf32> to vector<4x8xf32>
    %60 = arith.mulf %58, %59 : vector<4x8xf32>
    %61 = arith.addf %55, %60 : vector<4x8xf32>
    %62 = vector.extract_strided_slice %3 {offsets = [0, 9], sizes = [4, 1], strides = [1, 1]} : vector<4x16xf32> to vector<4x1xf32>
    %63 = vector.extract_strided_slice %6 {offsets = [0, 72], sizes = [1, 8], strides = [1, 1]} : vector<4x128xf32> to vector<1x8xf32>
    %64 = vector.broadcast %62 : vector<4x1xf32> to vector<4x8xf32>
    %65 = vector.broadcast %63 : vector<1x8xf32> to vector<4x8xf32>
    %66 = arith.mulf %64, %65 : vector<4x8xf32>
    %67 = arith.addf %61, %66 : vector<4x8xf32>
    %68 = vector.extract_strided_slice %3 {offsets = [0, 10], sizes = [4, 1], strides = [1, 1]} : vector<4x16xf32> to vector<4x1xf32>
    %69 = vector.extract_strided_slice %6 {offsets = [0, 80], sizes = [1, 8], strides = [1, 1]} : vector<4x128xf32> to vector<1x8xf32>
    %70 = vector.broadcast %68 : vector<4x1xf32> to vector<4x8xf32>
    %71 = vector.broadcast %69 : vector<1x8xf32> to vector<4x8xf32>
    %72 = arith.mulf %70, %71 : vector<4x8xf32>
    %73 = arith.addf %67, %72 : vector<4x8xf32>
    %74 = vector.extract_strided_slice %3 {offsets = [0, 11], sizes = [4, 1], strides = [1, 1]} : vector<4x16xf32> to vector<4x1xf32>
    %75 = vector.extract_strided_slice %6 {offsets = [0, 88], sizes = [1, 8], strides = [1, 1]} : vector<4x128xf32> to vector<1x8xf32>
    %76 = vector.broadcast %74 : vector<4x1xf32> to vector<4x8xf32>
    %77 = vector.broadcast %75 : vector<1x8xf32> to vector<4x8xf32>
    %78 = arith.mulf %76, %77 : vector<4x8xf32>
    %79 = arith.addf %73, %78 : vector<4x8xf32>
    %80 = vector.extract_strided_slice %3 {offsets = [0, 12], sizes = [4, 1], strides = [1, 1]} : vector<4x16xf32> to vector<4x1xf32>
    %81 = vector.extract_strided_slice %6 {offsets = [0, 96], sizes = [1, 8], strides = [1, 1]} : vector<4x128xf32> to vector<1x8xf32>
    %82 = vector.broadcast %80 : vector<4x1xf32> to vector<4x8xf32>
    %83 = vector.broadcast %81 : vector<1x8xf32> to vector<4x8xf32>
    %84 = arith.mulf %82, %83 : vector<4x8xf32>
    %85 = arith.addf %79, %84 : vector<4x8xf32>
    %86 = vector.extract_strided_slice %3 {offsets = [0, 13], sizes = [4, 1], strides = [1, 1]} : vector<4x16xf32> to vector<4x1xf32>
    %87 = vector.extract_strided_slice %6 {offsets = [0, 104], sizes = [1, 8], strides = [1, 1]} : vector<4x128xf32> to vector<1x8xf32>
    %88 = vector.broadcast %86 : vector<4x1xf32> to vector<4x8xf32>
    %89 = vector.broadcast %87 : vector<1x8xf32> to vector<4x8xf32>
    %90 = arith.mulf %88, %89 : vector<4x8xf32>
    %91 = arith.addf %85, %90 : vector<4x8xf32>
    %92 = vector.extract_strided_slice %3 {offsets = [0, 14], sizes = [4, 1], strides = [1, 1]} : vector<4x16xf32> to vector<4x1xf32>
    %93 = vector.extract_strided_slice %6 {offsets = [0, 112], sizes = [1, 8], strides = [1, 1]} : vector<4x128xf32> to vector<1x8xf32>
    %94 = vector.broadcast %92 : vector<4x1xf32> to vector<4x8xf32>
    %95 = vector.broadcast %93 : vector<1x8xf32> to vector<4x8xf32>
    %96 = arith.mulf %94, %95 : vector<4x8xf32>
    %97 = arith.addf %91, %96 : vector<4x8xf32>
    %98 = vector.extract_strided_slice %3 {offsets = [0, 15], sizes = [4, 1], strides = [1, 1]} : vector<4x16xf32> to vector<4x1xf32>
    %99 = vector.extract_strided_slice %6 {offsets = [0, 120], sizes = [1, 8], strides = [1, 1]} : vector<4x128xf32> to vector<1x8xf32>
    %100 = vector.broadcast %98 : vector<4x1xf32> to vector<4x8xf32>
    %101 = vector.broadcast %99 : vector<1x8xf32> to vector<4x8xf32>
    %102 = arith.mulf %100, %101 : vector<4x8xf32>
    %103 = arith.addf %97, %102 : vector<4x8xf32>
    %c0_9 = arith.constant 0 : index
    %c0_10 = arith.constant 0 : index
    %c0_11 = arith.constant 0 : index
    %c0_12 = arith.constant 0 : index
    %104 = vector.load %arg5[%c0_9, %c0_10, %c0_11, %c0_12] : memref<1x4x4x8xf32, #tpu.memory_space<vmem>>, vector<1x1x4x8xf32>
    %105 = vector.shape_cast %104 : vector<1x1x4x8xf32> to vector<4x8xf32>
    %106 = vector.shape_cast %103 : vector<4x8xf32> to vector<1x1x4x8xf32>
    tpu.vector_store %arg5[%c0_9, %c0_10, %c0_11, %c0_12], %106 {strides = array<i32>} : memref<1x4x4x8xf32, #tpu.memory_space<vmem>>, vector<1x1x4x8xf32>,
    %cst_13 = arith.constant 0.000000e+00 : f32
    %107 = vector.broadcast %cst_13 : f32 to vector<4x8xf32>
    %108 = vector.extract_strided_slice %3 {offsets = [0, 0], sizes = [4, 1], strides = [1, 1]} : vector<4x16xf32> to vector<4x1xf32>
    %109 = vector.extract_strided_slice %6 {offsets = [1, 0], sizes = [1, 8], strides = [1, 1]} : vector<4x128xf32> to vector<1x8xf32>
    %110 = vector.broadcast %108 : vector<4x1xf32> to vector<4x8xf32>
    %111 = vector.broadcast %109 : vector<1x8xf32> to vector<4x8xf32>
    %112 = arith.mulf %110, %111 : vector<4x8xf32>
    %113 = arith.addf %107, %112 : vector<4x8xf32>
    %114 = vector.extract_strided_slice %3 {offsets = [0, 1], sizes = [4, 1], strides = [1, 1]} : vector<4x16xf32> to vector<4x1xf32>
    %115 = vector.extract_strided_slice %6 {offsets = [1, 8], sizes = [1, 8], strides = [1, 1]} : vector<4x128xf32> to vector<1x8xf32>
    %116 = vector.broadcast %114 : vector<4x1xf32> to vector<4x8xf32>
    %117 = vector.broadcast %115 : vector<1x8xf32> to vector<4x8xf32>
    %118 = arith.mulf %116, %117 : vector<4x8xf32>
    %119 = arith.addf %113, %118 : vector<4x8xf32>
    %120 = vector.extract_strided_slice %3 {offsets = [0, 2], sizes = [4, 1], strides = [1, 1]} : vector<4x16xf32> to vector<4x1xf32>
    %121 = vector.extract_strided_slice %6 {offsets = [1, 16], sizes = [1, 8], strides = [1, 1]} : vector<4x128xf32> to vector<1x8xf32>
    %122 = vector.broadcast %120 : vector<4x1xf32> to vector<4x8xf32>
    %123 = vector.broadcast %121 : vector<1x8xf32> to vector<4x8xf32>
    %124 = arith.mulf %122, %123 : vector<4x8xf32>
    %125 = arith.addf %119, %124 : vector<4x8xf32>
    %126 = vector.extract_strided_slice %3 {offsets = [0, 3], sizes = [4, 1], strides = [1, 1]} : vector<4x16xf32> to vector<4x1xf32>
    %127 = vector.extract_strided_slice %6 {offsets = [1, 24], sizes = [1, 8], strides = [1, 1]} : vector<4x128xf32> to vector<1x8xf32>
    %128 = vector.broadcast %126 : vector<4x1xf32> to vector<4x8xf32>
    %129 = vector.broadcast %127 : vector<1x8xf32> to vector<4x8xf32>
    %130 = arith.mulf %128, %129 : vector<4x8xf32>
    %131 = arith.addf %125, %130 : vector<4x8xf32>
    %132 = vector.extract_strided_slice %3 {offsets = [0, 4], sizes = [4, 1], strides = [1, 1]} : vector<4x16xf32> to vector<4x1xf32>
    %133 = vector.extract_strided_slice %6 {offsets = [1, 32], sizes = [1, 8], strides = [1, 1]} : vector<4x128xf32> to vector<1x8xf32>
    %134 = vector.broadcast %132 : vector<4x1xf32> to vector<4x8xf32>
    %135 = vector.broadcast %133 : vector<1x8xf32> to vector<4x8xf32>
    %136 = arith.mulf %134, %135 : vector<4x8xf32>
    %137 = arith.addf %131, %136 : vector<4x8xf32>
    %138 = vector.extract_strided_slice %3 {offsets = [0, 5], sizes = [4, 1], strides = [1, 1]} : vector<4x16xf32> to vector<4x1xf32>
    %139 = vector.extract_strided_slice %6 {offsets = [1, 40], sizes = [1, 8], strides = [1, 1]} : vector<4x128xf32> to vector<1x8xf32>
    %140 = vector.broadcast %138 : vector<4x1xf32> to vector<4x8xf32>
    %141 = vector.broadcast %139 : vector<1x8xf32> to vector<4x8xf32>
    %142 = arith.mulf %140, %141 : vector<4x8xf32>
    %143 = arith.addf %137, %142 : vector<4x8xf32>
    %144 = vector.extract_strided_slice %3 {offsets = [0, 6], sizes = [4, 1], strides = [1, 1]} : vector<4x16xf32> to vector<4x1xf32>
    %145 = vector.extract_strided_slice %6 {offsets = [1, 48], sizes = [1, 8], strides = [1, 1]} : vector<4x128xf32> to vector<1x8xf32>
    %146 = vector.broadcast %144 : vector<4x1xf32> to vector<4x8xf32>
    %147 = vector.broadcast %145 : vector<1x8xf32> to vector<4x8xf32>
    %148 = arith.mulf %146, %147 : vector<4x8xf32>
    %149 = arith.addf %143, %148 : vector<4x8xf32>
    %150 = vector.extract_strided_slice %3 {offsets = [0, 7], sizes = [4, 1], strides = [1, 1]} : vector<4x16xf32> to vector<4x1xf32>
    %151 = vector.extract_strided_slice %6 {offsets = [1, 56], sizes = [1, 8], strides = [1, 1]} : vector<4x128xf32> to vector<1x8xf32>
    %152 = vector.broadcast %150 : vector<4x1xf32> to vector<4x8xf32>
    %153 = vector.broadcast %151 : vector<1x8xf32> to vector<4x8xf32>
    %154 = arith.mulf %152, %153 : vector<4x8xf32>
    %155 = arith.addf %149, %154 : vector<4x8xf32>
    %156 = vector.extract_strided_slice %3 {offsets = [0, 8], sizes = [4, 1], strides = [1, 1]} : vector<4x16xf32> to vector<4x1xf32>
    %157 = vector.extract_strided_slice %6 {offsets = [1, 64], sizes = [1, 8], strides = [1, 1]} : vector<4x128xf32> to vector<1x8xf32>
    %158 = vector.broadcast %156 : vector<4x1xf32> to vector<4x8xf32>
    %159 = vector.broadcast %157 : vector<1x8xf32> to vector<4x8xf32>
    %160 = arith.mulf %158, %159 : vector<4x8xf32>
    %161 = arith.addf %155, %160 : vector<4x8xf32>
    %162 = vector.extract_strided_slice %3 {offsets = [0, 9], sizes = [4, 1], strides = [1, 1]} : vector<4x16xf32> to vector<4x1xf32>
    %163 = vector.extract_strided_slice %6 {offsets = [1, 72], sizes = [1, 8], strides = [1, 1]} : vector<4x128xf32> to vector<1x8xf32>
    %164 = vector.broadcast %162 : vector<4x1xf32> to vector<4x8xf32>
    %165 = vector.broadcast %163 : vector<1x8xf32> to vector<4x8xf32>
    %166 = arith.mulf %164, %165 : vector<4x8xf32>
    %167 = arith.addf %161, %166 : vector<4x8xf32>
    %168 = vector.extract_strided_slice %3 {offsets = [0, 10], sizes = [4, 1], strides = [1, 1]} : vector<4x16xf32> to vector<4x1xf32>
    %169 = vector.extract_strided_slice %6 {offsets = [1, 80], sizes = [1, 8], strides = [1, 1]} : vector<4x128xf32> to vector<1x8xf32>
    %170 = vector.broadcast %168 : vector<4x1xf32> to vector<4x8xf32>
    %171 = vector.broadcast %169 : vector<1x8xf32> to vector<4x8xf32>
    %172 = arith.mulf %170, %171 : vector<4x8xf32>
    %173 = arith.addf %167, %172 : vector<4x8xf32>
    %174 = vector.extract_strided_slice %3 {offsets = [0, 11], sizes = [4, 1], strides = [1, 1]} : vector<4x16xf32> to vector<4x1xf32>
    %175 = vector.extract_strided_slice %6 {offsets = [1, 88], sizes = [1, 8], strides = [1, 1]} : vector<4x128xf32> to vector<1x8xf32>
    %176 = vector.broadcast %174 : vector<4x1xf32> to vector<4x8xf32>
    %177 = vector.broadcast %175 : vector<1x8xf32> to vector<4x8xf32>
    %178 = arith.mulf %176, %177 : vector<4x8xf32>
    %179 = arith.addf %173, %178 : vector<4x8xf32>
    %180 = vector.extract_strided_slice %3 {offsets = [0, 12], sizes = [4, 1], strides = [1, 1]} : vector<4x16xf32> to vector<4x1xf32>
    %181 = vector.extract_strided_slice %6 {offsets = [1, 96], sizes = [1, 8], strides = [1, 1]} : vector<4x128xf32> to vector<1x8xf32>
    %182 = vector.broadcast %180 : vector<4x1xf32> to vector<4x8xf32>
    %183 = vector.broadcast %181 : vector<1x8xf32> to vector<4x8xf32>
    %184 = arith.mulf %182, %183 : vector<4x8xf32>
    %185 = arith.addf %179, %184 : vector<4x8xf32>
    %186 = vector.extract_strided_slice %3 {offsets = [0, 13], sizes = [4, 1], strides = [1, 1]} : vector<4x16xf32> to vector<4x1xf32>
    %187 = vector.extract_strided_slice %6 {offsets = [1, 104], sizes = [1, 8], strides = [1, 1]} : vector<4x128xf32> to vector<1x8xf32>
    %188 = vector.broadcast %186 : vector<4x1xf32> to vector<4x8xf32>
    %189 = vector.broadcast %187 : vector<1x8xf32> to vector<4x8xf32>
    %190 = arith.mulf %188, %189 : vector<4x8xf32>
    %191 = arith.addf %185, %190 : vector<4x8xf32>
    %192 = vector.extract_strided_slice %3 {offsets = [0, 14], sizes = [4, 1], strides = [1, 1]} : vector<4x16xf32> to vector<4x1xf32>
    %193 = vector.extract_strided_slice %6 {offsets = [1, 112], sizes = [1, 8], strides = [1, 1]} : vector<4x128xf32> to vector<1x8xf32>
    %194 = vector.broadcast %192 : vector<4x1xf32> to vector<4x8xf32>
    %195 = vector.broadcast %193 : vector<1x8xf32> to vector<4x8xf32>
    %196 = arith.mulf %194, %195 : vector<4x8xf32>
    %197 = arith.addf %191, %196 : vector<4x8xf32>
    %198 = vector.extract_strided_slice %3 {offsets = [0, 15], sizes = [4, 1], strides = [1, 1]} : vector<4x16xf32> to vector<4x1xf32>
    %199 = vector.extract_strided_slice %6 {offsets = [1, 120], sizes = [1, 8], strides = [1, 1]} : vector<4x128xf32> to vector<1x8xf32>
    %200 = vector.broadcast %198 : vector<4x1xf32> to vector<4x8xf32>
    %201 = vector.broadcast %199 : vector<1x8xf32> to vector<4x8xf32>
    %202 = arith.mulf %200, %201 : vector<4x8xf32>
    %203 = arith.addf %197, %202 : vector<4x8xf32>
    %c0_14 = arith.constant 0 : index
    %c1 = arith.constant 1 : index
    %c0_15 = arith.constant 0 : index
    %c0_16 = arith.constant 0 : index
    %204 = vector.load %arg5[%c0_14, %c1, %c0_15, %c0_16] : memref<1x4x4x8xf32, #tpu.memory_space<vmem>>, vector<1x1x4x8xf32>
    %205 = vector.shape_cast %204 : vector<1x1x4x8xf32> to vector<4x8xf32>
    %206 = vector.shape_cast %203 : vector<4x8xf32> to vector<1x1x4x8xf32>
    tpu.vector_store %arg5[%c0_14, %c1, %c0_15, %c0_16], %206 {strides = array<i32>} : memref<1x4x4x8xf32, #tpu.memory_space<vmem>>, vector<1x1x4x8xf32>,
    %cst_17 = arith.constant 0.000000e+00 : f32
    %207 = vector.broadcast %cst_17 : f32 to vector<4x8xf32>
    %208 = vector.extract_strided_slice %3 {offsets = [0, 0], sizes = [4, 1], strides = [1, 1]} : vector<4x16xf32> to vector<4x1xf32>
    %209 = vector.extract_strided_slice %6 {offsets = [2, 0], sizes = [1, 8], strides = [1, 1]} : vector<4x128xf32> to vector<1x8xf32>
    %210 = vector.broadcast %208 : vector<4x1xf32> to vector<4x8xf32>
    %211 = vector.broadcast %209 : vector<1x8xf32> to vector<4x8xf32>
    %212 = arith.mulf %210, %211 : vector<4x8xf32>
    %213 = arith.addf %207, %212 : vector<4x8xf32>
    %214 = vector.extract_strided_slice %3 {offsets = [0, 1], sizes = [4, 1], strides = [1, 1]} : vector<4x16xf32> to vector<4x1xf32>
    %215 = vector.extract_strided_slice %6 {offsets = [2, 8], sizes = [1, 8], strides = [1, 1]} : vector<4x128xf32> to vector<1x8xf32>
    %216 = vector.broadcast %214 : vector<4x1xf32> to vector<4x8xf32>
    %217 = vector.broadcast %215 : vector<1x8xf32> to vector<4x8xf32>
    %218 = arith.mulf %216, %217 : vector<4x8xf32>
    %219 = arith.addf %213, %218 : vector<4x8xf32>
    %220 = vector.extract_strided_slice %3 {offsets = [0, 2], sizes = [4, 1], strides = [1, 1]} : vector<4x16xf32> to vector<4x1xf32>
    %221 = vector.extract_strided_slice %6 {offsets = [2, 16], sizes = [1, 8], strides = [1, 1]} : vector<4x128xf32> to vector<1x8xf32>
    %222 = vector.broadcast %220 : vector<4x1xf32> to vector<4x8xf32>
    %223 = vector.broadcast %221 : vector<1x8xf32> to vector<4x8xf32>
    %224 = arith.mulf %222, %223 : vector<4x8xf32>
    %225 = arith.addf %219, %224 : vector<4x8xf32>
    %226 = vector.extract_strided_slice %3 {offsets = [0, 3], sizes = [4, 1], strides = [1, 1]} : vector<4x16xf32> to vector<4x1xf32>
    %227 = vector.extract_strided_slice %6 {offsets = [2, 24], sizes = [1, 8], strides = [1, 1]} : vector<4x128xf32> to vector<1x8xf32>
    %228 = vector.broadcast %226 : vector<4x1xf32> to vector<4x8xf32>
    %229 = vector.broadcast %227 : vector<1x8xf32> to vector<4x8xf32>
    %230 = arith.mulf %228, %229 : vector<4x8xf32>
    %231 = arith.addf %225, %230 : vector<4x8xf32>
    %232 = vector.extract_strided_slice %3 {offsets = [0, 4], sizes = [4, 1], strides = [1, 1]} : vector<4x16xf32> to vector<4x1xf32>
    %233 = vector.extract_strided_slice %6 {offsets = [2, 32], sizes = [1, 8], strides = [1, 1]} : vector<4x128xf32> to vector<1x8xf32>
    %234 = vector.broadcast %232 : vector<4x1xf32> to vector<4x8xf32>
    %235 = vector.broadcast %233 : vector<1x8xf32> to vector<4x8xf32>
    %236 = arith.mulf %234, %235 : vector<4x8xf32>
    %237 = arith.addf %231, %236 : vector<4x8xf32>
    %238 = vector.extract_strided_slice %3 {offsets = [0, 5], sizes = [4, 1], strides = [1, 1]} : vector<4x16xf32> to vector<4x1xf32>
    %239 = vector.extract_strided_slice %6 {offsets = [2, 40], sizes = [1, 8], strides = [1, 1]} : vector<4x128xf32> to vector<1x8xf32>
    %240 = vector.broadcast %238 : vector<4x1xf32> to vector<4x8xf32>
    %241 = vector.broadcast %239 : vector<1x8xf32> to vector<4x8xf32>
    %242 = arith.mulf %240, %241 : vector<4x8xf32>
    %243 = arith.addf %237, %242 : vector<4x8xf32>
    %244 = vector.extract_strided_slice %3 {offsets = [0, 6], sizes = [4, 1], strides = [1, 1]} : vector<4x16xf32> to vector<4x1xf32>
    %245 = vector.extract_strided_slice %6 {offsets = [2, 48], sizes = [1, 8], strides = [1, 1]} : vector<4x128xf32> to vector<1x8xf32>
    %246 = vector.broadcast %244 : vector<4x1xf32> to vector<4x8xf32>
    %247 = vector.broadcast %245 : vector<1x8xf32> to vector<4x8xf32>
    %248 = arith.mulf %246, %247 : vector<4x8xf32>
    %249 = arith.addf %243, %248 : vector<4x8xf32>
    %250 = vector.extract_strided_slice %3 {offsets = [0, 7], sizes = [4, 1], strides = [1, 1]} : vector<4x16xf32> to vector<4x1xf32>
    %251 = vector.extract_strided_slice %6 {offsets = [2, 56], sizes = [1, 8], strides = [1, 1]} : vector<4x128xf32> to vector<1x8xf32>
    %252 = vector.broadcast %250 : vector<4x1xf32> to vector<4x8xf32>
    %253 = vector.broadcast %251 : vector<1x8xf32> to vector<4x8xf32>
    %254 = arith.mulf %252, %253 : vector<4x8xf32>
    %255 = arith.addf %249, %254 : vector<4x8xf32>
    %256 = vector.extract_strided_slice %3 {offsets = [0, 8], sizes = [4, 1], strides = [1, 1]} : vector<4x16xf32> to vector<4x1xf32>
    %257 = vector.extract_strided_slice %6 {offsets = [2, 64], sizes = [1, 8], strides = [1, 1]} : vector<4x128xf32> to vector<1x8xf32>
    %258 = vector.broadcast %256 : vector<4x1xf32> to vector<4x8xf32>
    %259 = vector.broadcast %257 : vector<1x8xf32> to vector<4x8xf32>
    %260 = arith.mulf %258, %259 : vector<4x8xf32>
    %261 = arith.addf %255, %260 : vector<4x8xf32>
    %262 = vector.extract_strided_slice %3 {offsets = [0, 9], sizes = [4, 1], strides = [1, 1]} : vector<4x16xf32> to vector<4x1xf32>
    %263 = vector.extract_strided_slice %6 {offsets = [2, 72], sizes = [1, 8], strides = [1, 1]} : vector<4x128xf32> to vector<1x8xf32>
    %264 = vector.broadcast %262 : vector<4x1xf32> to vector<4x8xf32>
    %265 = vector.broadcast %263 : vector<1x8xf32> to vector<4x8xf32>
    %266 = arith.mulf %264, %265 : vector<4x8xf32>
    %267 = arith.addf %261, %266 : vector<4x8xf32>
    %268 = vector.extract_strided_slice %3 {offsets = [0, 10], sizes = [4, 1], strides = [1, 1]} : vector<4x16xf32> to vector<4x1xf32>
    %269 = vector.extract_strided_slice %6 {offsets = [2, 80], sizes = [1, 8], strides = [1, 1]} : vector<4x128xf32> to vector<1x8xf32>
    %270 = vector.broadcast %268 : vector<4x1xf32> to vector<4x8xf32>
    %271 = vector.broadcast %269 : vector<1x8xf32> to vector<4x8xf32>
    %272 = arith.mulf %270, %271 : vector<4x8xf32>
    %273 = arith.addf %267, %272 : vector<4x8xf32>
    %274 = vector.extract_strided_slice %3 {offsets = [0, 11], sizes = [4, 1], strides = [1, 1]} : vector<4x16xf32> to vector<4x1xf32>
    %275 = vector.extract_strided_slice %6 {offsets = [2, 88], sizes = [1, 8], strides = [1, 1]} : vector<4x128xf32> to vector<1x8xf32>
    %276 = vector.broadcast %274 : vector<4x1xf32> to vector<4x8xf32>
    %277 = vector.broadcast %275 : vector<1x8xf32> to vector<4x8xf32>
    %278 = arith.mulf %276, %277 : vector<4x8xf32>
    %279 = arith.addf %273, %278 : vector<4x8xf32>
    %280 = vector.extract_strided_slice %3 {offsets = [0, 12], sizes = [4, 1], strides = [1, 1]} : vector<4x16xf32> to vector<4x1xf32>
    %281 = vector.extract_strided_slice %6 {offsets = [2, 96], sizes = [1, 8], strides = [1, 1]} : vector<4x128xf32> to vector<1x8xf32>
    %282 = vector.broadcast %280 : vector<4x1xf32> to vector<4x8xf32>
    %283 = vector.broadcast %281 : vector<1x8xf32> to vector<4x8xf32>
    %284 = arith.mulf %282, %283 : vector<4x8xf32>
    %285 = arith.addf %279, %284 : vector<4x8xf32>
    %286 = vector.extract_strided_slice %3 {offsets = [0, 13], sizes = [4, 1], strides = [1, 1]} : vector<4x16xf32> to vector<4x1xf32>
    %287 = vector.extract_strided_slice %6 {offsets = [2, 104], sizes = [1, 8], strides = [1, 1]} : vector<4x128xf32> to vector<1x8xf32>
    %288 = vector.broadcast %286 : vector<4x1xf32> to vector<4x8xf32>
    %289 = vector.broadcast %287 : vector<1x8xf32> to vector<4x8xf32>
    %290 = arith.mulf %288, %289 : vector<4x8xf32>
    %291 = arith.addf %285, %290 : vector<4x8xf32>
    %292 = vector.extract_strided_slice %3 {offsets = [0, 14], sizes = [4, 1], strides = [1, 1]} : vector<4x16xf32> to vector<4x1xf32>
    %293 = vector.extract_strided_slice %6 {offsets = [2, 112], sizes = [1, 8], strides = [1, 1]} : vector<4x128xf32> to vector<1x8xf32>
    %294 = vector.broadcast %292 : vector<4x1xf32> to vector<4x8xf32>
    %295 = vector.broadcast %293 : vector<1x8xf32> to vector<4x8xf32>
    %296 = arith.mulf %294, %295 : vector<4x8xf32>
    %297 = arith.addf %291, %296 : vector<4x8xf32>
    %298 = vector.extract_strided_slice %3 {offsets = [0, 15], sizes = [4, 1], strides = [1, 1]} : vector<4x16xf32> to vector<4x1xf32>
    %299 = vector.extract_strided_slice %6 {offsets = [2, 120], sizes = [1, 8], strides = [1, 1]} : vector<4x128xf32> to vector<1x8xf32>
    %300 = vector.broadcast %298 : vector<4x1xf32> to vector<4x8xf32>
    %301 = vector.broadcast %299 : vector<1x8xf32> to vector<4x8xf32>
    %302 = arith.mulf %300, %301 : vector<4x8xf32>
    %303 = arith.addf %297, %302 : vector<4x8xf32>
    %c0_18 = arith.constant 0 : index
    %c2 = arith.constant 2 : index
    %c0_19 = arith.constant 0 : index
    %c0_20 = arith.constant 0 : index
    %304 = vector.load %arg5[%c0_18, %c2, %c0_19, %c0_20] : memref<1x4x4x8xf32, #tpu.memory_space<vmem>>, vector<1x1x4x8xf32>
    %305 = vector.shape_cast %304 : vector<1x1x4x8xf32> to vector<4x8xf32>
    %306 = vector.shape_cast %303 : vector<4x8xf32> to vector<1x1x4x8xf32>
    tpu.vector_store %arg5[%c0_18, %c2, %c0_19, %c0_20], %306 {strides = array<i32>} : memref<1x4x4x8xf32, #tpu.memory_space<vmem>>, vector<1x1x4x8xf32>,
    %cst_21 = arith.constant 0.000000e+00 : f32
    %307 = vector.broadcast %cst_21 : f32 to vector<4x8xf32>
    %308 = vector.extract_strided_slice %3 {offsets = [0, 0], sizes = [4, 1], strides = [1, 1]} : vector<4x16xf32> to vector<4x1xf32>
    %309 = vector.extract_strided_slice %6 {offsets = [3, 0], sizes = [1, 8], strides = [1, 1]} : vector<4x128xf32> to vector<1x8xf32>
    %310 = vector.broadcast %308 : vector<4x1xf32> to vector<4x8xf32>
    %311 = vector.broadcast %309 : vector<1x8xf32> to vector<4x8xf32>
    %312 = arith.mulf %310, %311 : vector<4x8xf32>
    %313 = arith.addf %307, %312 : vector<4x8xf32>
    %314 = vector.extract_strided_slice %3 {offsets = [0, 1], sizes = [4, 1], strides = [1, 1]} : vector<4x16xf32> to vector<4x1xf32>
    %315 = vector.extract_strided_slice %6 {offsets = [3, 8], sizes = [1, 8], strides = [1, 1]} : vector<4x128xf32> to vector<1x8xf32>
    %316 = vector.broadcast %314 : vector<4x1xf32> to vector<4x8xf32>
    %317 = vector.broadcast %315 : vector<1x8xf32> to vector<4x8xf32>
    %318 = arith.mulf %316, %317 : vector<4x8xf32>
    %319 = arith.addf %313, %318 : vector<4x8xf32>
    %320 = vector.extract_strided_slice %3 {offsets = [0, 2], sizes = [4, 1], strides = [1, 1]} : vector<4x16xf32> to vector<4x1xf32>
    %321 = vector.extract_strided_slice %6 {offsets = [3, 16], sizes = [1, 8], strides = [1, 1]} : vector<4x128xf32> to vector<1x8xf32>
    %322 = vector.broadcast %320 : vector<4x1xf32> to vector<4x8xf32>
    %323 = vector.broadcast %321 : vector<1x8xf32> to vector<4x8xf32>
    %324 = arith.mulf %322, %323 : vector<4x8xf32>
    %325 = arith.addf %319, %324 : vector<4x8xf32>
    %326 = vector.extract_strided_slice %3 {offsets = [0, 3], sizes = [4, 1], strides = [1, 1]} : vector<4x16xf32> to vector<4x1xf32>
    %327 = vector.extract_strided_slice %6 {offsets = [3, 24], sizes = [1, 8], strides = [1, 1]} : vector<4x128xf32> to vector<1x8xf32>
    %328 = vector.broadcast %326 : vector<4x1xf32> to vector<4x8xf32>
    %329 = vector.broadcast %327 : vector<1x8xf32> to vector<4x8xf32>
    %330 = arith.mulf %328, %329 : vector<4x8xf32>
    %331 = arith.addf %325, %330 : vector<4x8xf32>
    %332 = vector.extract_strided_slice %3 {offsets = [0, 4], sizes = [4, 1], strides = [1, 1]} : vector<4x16xf32> to vector<4x1xf32>
    %333 = vector.extract_strided_slice %6 {offsets = [3, 32], sizes = [1, 8], strides = [1, 1]} : vector<4x128xf32> to vector<1x8xf32>
    %334 = vector.broadcast %332 : vector<4x1xf32> to vector<4x8xf32>
    %335 = vector.broadcast %333 : vector<1x8xf32> to vector<4x8xf32>
    %336 = arith.mulf %334, %335 : vector<4x8xf32>
    %337 = arith.addf %331, %336 : vector<4x8xf32>
    %338 = vector.extract_strided_slice %3 {offsets = [0, 5], sizes = [4, 1], strides = [1, 1]} : vector<4x16xf32> to vector<4x1xf32>
    %339 = vector.extract_strided_slice %6 {offsets = [3, 40], sizes = [1, 8], strides = [1, 1]} : vector<4x128xf32> to vector<1x8xf32>
    %340 = vector.broadcast %338 : vector<4x1xf32> to vector<4x8xf32>
    %341 = vector.broadcast %339 : vector<1x8xf32> to vector<4x8xf32>
    %342 = arith.mulf %340, %341 : vector<4x8xf32>
    %343 = arith.addf %337, %342 : vector<4x8xf32>
    %344 = vector.extract_strided_slice %3 {offsets = [0, 6], sizes = [4, 1], strides = [1, 1]} : vector<4x16xf32> to vector<4x1xf32>
    %345 = vector.extract_strided_slice %6 {offsets = [3, 48], sizes = [1, 8], strides = [1, 1]} : vector<4x128xf32> to vector<1x8xf32>
    %346 = vector.broadcast %344 : vector<4x1xf32> to vector<4x8xf32>
    %347 = vector.broadcast %345 : vector<1x8xf32> to vector<4x8xf32>
    %348 = arith.mulf %346, %347 : vector<4x8xf32>
    %349 = arith.addf %343, %348 : vector<4x8xf32>
    %350 = vector.extract_strided_slice %3 {offsets = [0, 7], sizes = [4, 1], strides = [1, 1]} : vector<4x16xf32> to vector<4x1xf32>
    %351 = vector.extract_strided_slice %6 {offsets = [3, 56], sizes = [1, 8], strides = [1, 1]} : vector<4x128xf32> to vector<1x8xf32>
    %352 = vector.broadcast %350 : vector<4x1xf32> to vector<4x8xf32>
    %353 = vector.broadcast %351 : vector<1x8xf32> to vector<4x8xf32>
    %354 = arith.mulf %352, %353 : vector<4x8xf32>
    %355 = arith.addf %349, %354 : vector<4x8xf32>
    %356 = vector.extract_strided_slice %3 {offsets = [0, 8], sizes = [4, 1], strides = [1, 1]} : vector<4x16xf32> to vector<4x1xf32>
    %357 = vector.extract_strided_slice %6 {offsets = [3, 64], sizes = [1, 8], strides = [1, 1]} : vector<4x128xf32> to vector<1x8xf32>
    %358 = vector.broadcast %356 : vector<4x1xf32> to vector<4x8xf32>
    %359 = vector.broadcast %357 : vector<1x8xf32> to vector<4x8xf32>
    %360 = arith.mulf %358, %359 : vector<4x8xf32>
    %361 = arith.addf %355, %360 : vector<4x8xf32>
    %362 = vector.extract_strided_slice %3 {offsets = [0, 9], sizes = [4, 1], strides = [1, 1]} : vector<4x16xf32> to vector<4x1xf32>
    %363 = vector.extract_strided_slice %6 {offsets = [3, 72], sizes = [1, 8], strides = [1, 1]} : vector<4x128xf32> to vector<1x8xf32>
    %364 = vector.broadcast %362 : vector<4x1xf32> to vector<4x8xf32>
    %365 = vector.broadcast %363 : vector<1x8xf32> to vector<4x8xf32>
    %366 = arith.mulf %364, %365 : vector<4x8xf32>
    %367 = arith.addf %361, %366 : vector<4x8xf32>
    %368 = vector.extract_strided_slice %3 {offsets = [0, 10], sizes = [4, 1], strides = [1, 1]} : vector<4x16xf32> to vector<4x1xf32>
    %369 = vector.extract_strided_slice %6 {offsets = [3, 80], sizes = [1, 8], strides = [1, 1]} : vector<4x128xf32> to vector<1x8xf32>
    %370 = vector.broadcast %368 : vector<4x1xf32> to vector<4x8xf32>
    %371 = vector.broadcast %369 : vector<1x8xf32> to vector<4x8xf32>
    %372 = arith.mulf %370, %371 : vector<4x8xf32>
    %373 = arith.addf %367, %372 : vector<4x8xf32>
    %374 = vector.extract_strided_slice %3 {offsets = [0, 11], sizes = [4, 1], strides = [1, 1]} : vector<4x16xf32> to vector<4x1xf32>
    %375 = vector.extract_strided_slice %6 {offsets = [3, 88], sizes = [1, 8], strides = [1, 1]} : vector<4x128xf32> to vector<1x8xf32>
    %376 = vector.broadcast %374 : vector<4x1xf32> to vector<4x8xf32>
    %377 = vector.broadcast %375 : vector<1x8xf32> to vector<4x8xf32>
    %378 = arith.mulf %376, %377 : vector<4x8xf32>
    %379 = arith.addf %373, %378 : vector<4x8xf32>
    %380 = vector.extract_strided_slice %3 {offsets = [0, 12], sizes = [4, 1], strides = [1, 1]} : vector<4x16xf32> to vector<4x1xf32>
    %381 = vector.extract_strided_slice %6 {offsets = [3, 96], sizes = [1, 8], strides = [1, 1]} : vector<4x128xf32> to vector<1x8xf32>
    %382 = vector.broadcast %380 : vector<4x1xf32> to vector<4x8xf32>
    %383 = vector.broadcast %381 : vector<1x8xf32> to vector<4x8xf32>
    %384 = arith.mulf %382, %383 : vector<4x8xf32>
    %385 = arith.addf %379, %384 : vector<4x8xf32>
    %386 = vector.extract_strided_slice %3 {offsets = [0, 13], sizes = [4, 1], strides = [1, 1]} : vector<4x16xf32> to vector<4x1xf32>
    %387 = vector.extract_strided_slice %6 {offsets = [3, 104], sizes = [1, 8], strides = [1, 1]} : vector<4x128xf32> to vector<1x8xf32>
    %388 = vector.broadcast %386 : vector<4x1xf32> to vector<4x8xf32>
    %389 = vector.broadcast %387 : vector<1x8xf32> to vector<4x8xf32>
    %390 = arith.mulf %388, %389 : vector<4x8xf32>
    %391 = arith.addf %385, %390 : vector<4x8xf32>
    %392 = vector.extract_strided_slice %3 {offsets = [0, 14], sizes = [4, 1], strides = [1, 1]} : vector<4x16xf32> to vector<4x1xf32>
    %393 = vector.extract_strided_slice %6 {offsets = [3, 112], sizes = [1, 8], strides = [1, 1]} : vector<4x128xf32> to vector<1x8xf32>
    %394 = vector.broadcast %392 : vector<4x1xf32> to vector<4x8xf32>
    %395 = vector.broadcast %393 : vector<1x8xf32> to vector<4x8xf32>
    %396 = arith.mulf %394, %395 : vector<4x8xf32>
    %397 = arith.addf %391, %396 : vector<4x8xf32>
    %398 = vector.extract_strided_slice %3 {offsets = [0, 15], sizes = [4, 1], strides = [1, 1]} : vector<4x16xf32> to vector<4x1xf32>
    %399 = vector.extract_strided_slice %6 {offsets = [3, 120], sizes = [1, 8], strides = [1, 1]} : vector<4x128xf32> to vector<1x8xf32>
    %400 = vector.broadcast %398 : vector<4x1xf32> to vector<4x8xf32>
    %401 = vector.broadcast %399 : vector<1x8xf32> to vector<4x8xf32>
    %402 = arith.mulf %400, %401 : vector<4x8xf32>
    %403 = arith.addf %397, %402 : vector<4x8xf32>
    %c0_22 = arith.constant 0 : index
    %c3 = arith.constant 3 : index
    %c0_23 = arith.constant 0 : index
    %c0_24 = arith.constant 0 : index
    %404 = vector.load %arg5[%c0_22, %c3, %c0_23, %c0_24] : memref<1x4x4x8xf32, #tpu.memory_space<vmem>>, vector<1x1x4x8xf32>
    %405 = vector.shape_cast %404 : vector<1x1x4x8xf32> to vector<4x8xf32>
    %406 = vector.shape_cast %403 : vector<4x8xf32> to vector<1x1x4x8xf32>
    tpu.vector_store %arg5[%c0_22, %c3, %c0_23, %c0_24], %406 {strides = array<i32>} : memref<1x4x4x8xf32, #tpu.memory_space<vmem>>, vector<1x1x4x8xf32>,
    return
  }
  func.func @transform_0(%arg0: i32, %arg1: memref<6xi32, #tpu.memory_space<smem>>) -> (i32, i32, i32) {
    %c0_i32 = arith.constant 0 : i32
    %c0_i32_0 = arith.constant 0 : i32
    %c0_i32_1 = arith.constant 0 : i32
    return %arg0, %c0_i32, %c0_i32_0 : i32, i32, i32
  }
  func.func @transform_1(%arg0: i32, %arg1: memref<6xi32, #tpu.memory_space<smem>>) -> (i32, i32, i32) {
    %c0_i32 = arith.constant 0 : i32
    %c0_i32_0 = arith.constant 0 : i32
    %c0_i32_1 = arith.constant 0 : i32
    return %arg0, %c0_i32, %c0_i32_0 : i32, i32, i32
  }
  func.func @transform_2(%arg0: i32, %arg1: memref<6xi32, #tpu.memory_space<smem>>) -> (i32, i32, i32) {
    %0 = arith.index_cast %arg0 : i32 to index
    %1 = memref.load %arg1[%0] : memref<6xi32, #tpu.memory_space<smem>>
    %c0_i32 = arith.constant 0 : i32
    %c0_i32_0 = arith.constant 0 : i32
    %c0_i32_1 = arith.constant 0 : i32
    return %1, %c0_i32, %c0_i32_0 : i32, i32, i32
  }
  func.func @transform_3(%arg0: i32, %arg1: memref<6xi32, #tpu.memory_space<smem>>) -> (i32, i32, i32, i32) {
    %c0_i32 = arith.constant 0 : i32
    %c0_i32_0 = arith.constant 0 : i32
    %c0_i32_1 = arith.constant 0 : i32
    %c0_i32_2 = arith.constant 0 : i32
    return %arg0, %c0_i32, %c0_i32_0, %c0_i32_1 : i32, i32, i32, i32
  }
}

</mosaic_0001>

<bundles_post_ra>
// kernel: tpu_custom_call.1
= control target key start
LH: loop header
LB: loop body
LE: loop exit
PB: predicated region body
PF: predicated region fallthrough
CT: control target
= control target key end

     0   :  { %s1250_s18 = smov [#allocation3]   ;;  %s1879_s0 = inlined_call_operand.hbm [shape: s32[6], index: 0, kind: input, shape index: {}]   ;;  %s1880_s1 = inlined_call_operand.hbm [shape: f32[6,4,16], index: 1, kind: input, shape index: {}]   ;;  %s1881_s2 = inlined_call_operand.hbm [shape: f32[6,4,16], index: 2, kind: input, shape index: {}]   ;;  %s1882_s3 = inlined_call_operand.hbm [shape: f32[2,16,128], index: 3, kind: input, shape index: {}]   ;;  %s1883_s4 = inlined_call_operand.hbm [shape: f32[6,4,4,8], index: 4, kind: output, shape index: {}]  }
   0x1   :  { %1891 = sst [smem:[#allocation23_spill]] %s1881_s2  ;;  %s10_s17 = sshll.u32 %s1879_s0, 4  ;;  %s11_s17 = int_to_ptr.hbm [resolvable:$true] %s10_s17 }
   0x2   :  { %13 = dma.hbm_to_smem %s11_s17, 16, %s1250_s18, [#allocation2] }
   0x3   :  { %1204 = dma.done.wait [#allocation2], 16 }
   0x4   :  { %1205 = vsyncadd [#allocation2], 4294967280 }
   0x5   :  { %16 = sfence }
   0x6   :  { %17 = vsyncpa [#allocation5], 0 }
   0x7   :  { %19 = vsyncpa [#allocation5 + $0x1], 0 }
   0x8   :  { %20 = vsyncpa [#allocation8], 0 }
   0x9   :  { %22 = vsyncpa [#allocation8 + $0x1], 0 }
   0xa   :  { %23 = vsyncpa [#allocation6], 0 }
   0xb   :  { %25 = vsyncpa [#allocation6 + $0x1], 0  ;;  %s1313_s19 = smov 0   ;;  %s1315_s20 = smov 0  }
   0xc   :  { %s1317_s21 = smov 0   ;;  %s1319_s22 = smov 0  }
   0xd   :  { %s1321_s0 = smov 0   ;;  %s1323_s23 = smov 0  }
   0xe   :  { %s1325_s24 = smov 0  }
   0xf LB: > { %1892 = sst [smem:[#allocation18_spill]] %s1236_s22  ;;  %s1347_s25 = sadd.s32 4294967295, %s1248_s24   ;;  %s1248_s24 = sphi %s1325_s24, %s1914_s24   ;;  %s1244_s23 = sphi %s1323_s23, %s1922_s23   ;;  %s1240_s0 = sphi %s1321_s0, %s1921_s0   ;;  %s1236_s22 = sphi %s1319_s22, %s1920_s22   ;;  %s1232_s21 = sphi %s1317_s21, %s1919_s21   ;;  %s1228_s20 = sphi %s1315_s20, %s1918_s20   ;;  %s1224_s19 = sphi %s1313_s19, %s1917_s19  }
  0x10   : > { %s884_s26 = sadd.s32 4294967294, %s1248_s24   ;;  %s1351_s27 = sadd.s32 1, %s1248_s24  }
  0x11   : > { %1893 = sst [smem:[#allocation19_spill]] %s1351_s27  ;;  %s38_s28 = sadd.s32 1, %s1244_s23 }
  0x12   : > { %s35_s29 = ssub.s32 %s1248_s24, %s1351_s27  ;;  %p45_p0 = scmp.ne.s32.totalorder %s1244_s23, %s1240_s0 }
  0x13   : > { %p36_p1 = scmp.eq.s32.totalorder %s35_s29, 0  ;;  %p46_p2 = scmp.eq.s32.totalorder %s1248_s24, 0 }
  0x14   : > { %p51_p3 = scmp.ne.s32.totalorder %s1240_s0, %s1236_s22  ;;  %p52_p4 = scmp.eq.s32.totalorder %s1347_s25, 0 }
  0x15   : > { %s1363_s30 = scalar_select %p36_p1, %s1244_s23, %s38_s28  }
  0x16   : > { %p1368_p5 = por %p46_p2, %p45_p0  ;;  %p1375_p6 = por %p52_p4, %p51_p3 }
  0x17   : > { %1894 = sst [smem:[#allocation20_spill]] %s1363_s30  ;;  %s92_s8 = sadd.s32 1, %s1232_s21 }
  0x18   : > { %s1896_s6 = scalar_select %p1375_p6, 1, 0 }
  0x19   : > { %s87_s7 = sld [smem:[#allocation3 + %s1248_s24]]  ;;  %p99_p7 = scmp.ne.s32.totalorder %s1232_s21, %s1228_s20 }
  0x1a   : > { %s88_s9 = sld [smem:[#allocation3 + %s1351_s27]]  ;;  %p105_p8 = scmp.ne.s32.totalorder %s1228_s20, %s1224_s19 }
  0x1b   : > { %p129_p9 = scmp.eq.s32.totalorder %s1347_s25, 5  ;;  %p1386_p10 = por %p99_p7, %p46_p2 }
  0x1c   : > { %p135_p11 = scmp.eq.s32.totalorder %s884_s26, 5  ;;  %p1390_p12 = por %p105_p8, %p52_p4 }
  0x1d   : > { %p1397_p13 = por %p129_p9, %p45_p0  ;;  %p1890_p6 = scmp.lt.s32.totalorder %s1248_s24, 6 }
  0x1e   : > { %p1404_p1 = por %p135_p11, %p51_p3  ;;  %s1885_s14 = sand.u32 1, %s1244_s23  }
  0x1f   : > { %s1412_s16 = sshll.u32 %s1885_s14, 2  ;;  %s888_s17 = sshll.u32 %s1248_s24, 2 }
  0x20   : > { %s1900_s13 = scalar_select %p1404_p1, 1, 0 }
  0x21   : > { %s89_s15 = ssub.s32 %s87_s7, %s88_s9  ;;  %p1419_p0 = pnand %p1890_p6, %p1368_p5 }
  0x22   : > { %1901 = sst [smem:[#allocation21_spill]] %s1900_s13  ;;  %p90_p2 = scmp.eq.s32.totalorder %s89_s15, 0 }
  0x23   : > { %s174_s19 = sand.u32 1, %s1248_s24   ;;  %s1904_s2 = sld [smem:[#allocation23_spill]] }
  0x24   : > { %s1425_s26 = scalar_select %p90_p2, %s1232_s21, %s92_s8  }
  0x25   : > { %s178_s14 = scalar_lea.vmem [#allocation7], %s1412_s16  ;;  %s1433_s5 = scalar_lea.sflag [#allocation8], %s174_s19 }
  0x26   : > { %1903 = sst [smem:[#allocation22_spill]] %s1425_s26  ;;  %s186_s15 = sshll.u32 %s178_s14, 4  ;;  %s187_s15 = int_to_ptr.vmem [resolvable:$true] %s186_s15 }
  0x27   : > { %p1062_p4 = pneg %p1419_p0 }
  0x29   : > { %s182_s7 = scalar_lea.hbm %s1904_s2, %s888_s17  ;;  %s1065_s29 = scalar_lea.hbm %s1904_s2, 24 }
  0x2a   : > { %s184_s9 = sshll.u32 %s182_s7, 4  ;;  %s185_s9 = int_to_ptr.hbm [resolvable:$true] %s184_s9 }
  0x2b   : > { %s1058_s30 = sshra.s32 %s185_s9, 4  ;;  %s1059_s30 = int_to_ptr.hbm [resolvable:$true] %s1058_s30 }
  0x2c   : > { %s1060_s27 = scalar_lea.hbm %s1059_s30, 4  ;;  %p1066_p8 = scmp.lt.s32.totalorder %s1059_s30, %s1904_s2 }
  0x2d   : > { %p1061_p3 = scmp.ne.s32.totalorder %s1059_s30, %s1060_s27  ;;  %p1067_p9 = scmp.lt.s32.totalorder %s1065_s29, %s1060_s27 }
  0x2f   : > { %p1063_p5 = pnand %p1062_p4, %p1061_p3  ;;  %p1068_p11 = por %p1067_p9, %p1066_p8 }
  0x31   : > { %p1064_p7 = pneg %p1063_p5 }
  0x33   : > { %p1069_p2 = pnand %p1068_p11, %p1064_p7 }
  0x35   : > { %1072 = shalt.err (!%p1069_p2)
}
  0x36   : > { %926 = dma.hbm_to_vmem [thread:$0]  (!%p1419_p0), %s185_s9, 64, %s187_s15, %s1433_s5  }
  0x37   : > { %p1453_p3 = pnand %p1890_p6, %p1386_p10  ;;  %p894_p5 = scmp.ge.s32.totalorder %s1248_s24, 1 }
  0x38   : > { %p214_p7 = scmp.lt.s32.totalorder %s1248_s24, 7  ;;  %s163_s28 = scalar_lea.hbm %s1880_s1, %s888_s17 }
  0x39   : > { %s165_s29 = sshll.u32 %s163_s28, 4  ;;  %s159_s9 = scalar_lea.vmem [#allocation4], %s1412_s16  ;;  %s166_s29 = int_to_ptr.hbm [resolvable:$true] %s165_s29 }
  0x3a   : > { %p1459_p8 = pnand %p894_p5, %p214_p7  ;;  %s167_s15 = sshll.u32 %s159_s9, 4  ;;  %s168_s15 = int_to_ptr.vmem [resolvable:$true] %s167_s15 }
  0x3b   : > { %s1907_s7 = sand.u32 1, %s1244_s23   ;;  %s1088_s2 = sshra.s32 %s166_s29, 4  ;;  %s1089_s2 = int_to_ptr.hbm [resolvable:$true] %s1088_s2 }
  0x3c   : > { %s156_s14 = scalar_lea.sflag [#allocation5], %s1907_s7  ;;  %s1090_s26 = scalar_lea.hbm %s1089_s2, 4 }
  0x3d   : > { %p1091_p9 = scmp.ne.s32.totalorder %s1089_s2, %s1090_s26  ;;  %s1095_s19 = scalar_lea.hbm %s1880_s1, 24 }
  0x3e   : > { %p1096_p5 = scmp.lt.s32.totalorder %s1089_s2, %s1880_s1  ;;  %p1097_p7 = scmp.lt.s32.totalorder %s1095_s19, %s1090_s26 }
  0x3f   : > { %p1093_p11 = pnand %p1091_p9, %p1062_p4 }
  0x40   : > { %p1098_p6 = por %p1097_p7, %p1096_p5 }
  0x41   : > { %p1094_p2 = pneg %p1093_p11 }
  0x43   : > { %p1099_p1 = pnand %p1098_p6, %p1094_p2 }
  0x45   : > { %1102 = shalt.err (!%p1099_p1)
}
  0x46   : > { %923 = dma.hbm_to_vmem [thread:$0]  (!%p1419_p0), %s166_s29, 64, %s168_s15, %s156_s14  }
  0x47   : > { %s195_s16 = sand.u32 1, %s1232_s21   ;;  %p1908_p4 = scmp.lt.s32.totalorder %s1248_s24, 6 }
  0x48   : > { %s891_s22 = sshll.u32 %s195_s16, 4  ;;  %s1125_s16 = scalar_lea.hbm %s1882_s3, 32 }
  0x49   : > { %s912_s13 = scalar_select %p1386_p10, [#allocation3], [#allocation11] }
  0x4a   : > { %s913_s2 = scalar_select %p1386_p10, %s1248_s24, 0 }
  0x4b   : > { %s1924_s13 = smov (!%p1908_p4, %s912_s13), [#allocation12]  ;;  %p1909_p6 = pmov %p1908_p4 }
  0x4c   : > { %s197_s18 = scalar_lea.vmem [#allocation9], %s891_s22  ;;  %p1122_p10 = pneg %p1453_p3 }
  0x4d   : > { %s1926_s2 = smov (!%p1909_p6, %s913_s2), 0  ;;  %s206_s28 = sshll.u32 %s197_s18, 4  ;;  %s207_s28 = int_to_ptr.vmem [resolvable:$true] %s206_s28 }
  0x4e   : > { %s198_s26 = sld [smem:[%s1924_s13 + %s1926_s2]] }
  0x54   : > { %s908_s9 = sshll.u32 %s198_s26, 4 }
  0x55   : > { %s203_s17 = scalar_lea.hbm %s1882_s3, %s908_s9 }
  0x56   : > { %s204_s29 = sshll.u32 %s203_s17, 4  ;;  %s205_s29 = int_to_ptr.hbm [resolvable:$true] %s204_s29 }
  0x57   : > { %s1118_s15 = sshra.s32 %s205_s29, 4  ;;  %s1119_s15 = int_to_ptr.hbm [resolvable:$true] %s1118_s15 }
  0x58   : > { %s1120_s10 = scalar_lea.hbm %s1119_s15, 16  ;;  %p1126_p11 = scmp.lt.s32.totalorder %s1119_s15, %s1882_s3 }
  0x59   : > { %p1121_p1 = scmp.ne.s32.totalorder %s1119_s15, %s1120_s10  ;;  %p1127_p2 = scmp.lt.s32.totalorder %s1125_s16, %s1120_s10 }
  0x5b   : > { %p1123_p0 = pnand %p1122_p10, %p1121_p1  ;;  %p1128_p5 = por %p1127_p2, %p1126_p11 }
  0x5d   : > { %p1124_p9 = pneg %p1123_p0 }
  0x5f   : > { %p1129_p7 = pnand %p1128_p5, %p1124_p9 }
  0x61   : > { %1132 = shalt.err (!%p1129_p7)
}
  0x62   : > { %s1251_s2 = smov 128   ;;  %s1252_s26 = smov 8  }
  0x63   : > { %931 = dma.hbm_to_vmem [thread:$0]  (!%p1453_p3), %s205_s29, 256, %s207_s28, %s1433_s5, %s1251_s2, %s1251_s2, %s1252_s26  }
  0x64   : > { %218 = sbr.rel (%p1459_p8) target bundleno = 546 (0x222), region = 32  ;;  %s1509_s18 = sand.u32 (!%p1459_p8), 1, %s1240_s0  }
  0x65   : > { %s895_s9 = sshll.u32 (!%p1459_p8), %s1509_s18, 2  ;;  %s221_s7 = scalar_lea.sflag (!%p1459_p8), [#allocation5], %s1509_s18 }
  0x66   : > { %s224_s19 = scalar_lea.vmem (!%p1459_p8), [#allocation4], %s895_s9  ;;  %p1910_p4 = scmp.ne.s32.totalorder (!%p1459_p8), %s1896_s6, 0 }
  0x69   : > { %1207 = dma.done.wait (%p1910_p4), %s221_s7, 64  }
  0x6a   : > { %1209 = vsyncadd (%p1910_p4), %s221_s7, 4294967232  ;;  %s230_s5 = sand.u32 1, %s1347_s25   ;;  %s234_s27 = scalar_lea.vmem [#allocation7], %s895_s9 }
  0x6b   : > { %s231_s30 = scalar_lea.sflag [#allocation8], %s230_s5 }
  0x6c   : > { %1211 = dma.done.wait (%p1910_p4), %s231_s30, 64  }
  0x6d   : > { %1213 = vsyncadd (%p1910_p4), %s231_s30, 4294967232  ;;  %s242_s28 = sand.u32 1, %s1228_s20  }
  0x6e   : > { %s897_s17 = sshll.u32 %s242_s28, 4 }
  0x6f   : > { %s244_s29 = scalar_lea.vmem [#allocation9], %s897_s17 }
  0x70   : > { %1215 = dma.done.wait (%p1390_p12), %s231_s30, 256  }
  0x71   : > { %1217 = vsyncadd (%p1390_p12), %s231_s30, 4294967040  ;;  %v1253_v0 = vmov 3   ;;  %v1254_v1 = vmov 2   ;;  %v1255_v2 = vmov 0   ;;  %v282_v3 = vld [vmem:[%s244_s29 + $0x8] sm:$0xff]  ;;  %v281_v5 = vld [vmem:[%s244_s29] sm:$0xff] }
  0x72   : > { %1032 = vset.pattern.permute.xlu2 %v1253_v0  ;;  %1031 = vset.pattern.permute.xlu1 %v1254_v1  ;;  %v280_v4 = vld [vmem:[%s234_s27] sm:$0xf]  ;;  %v279_v6 = vld [vmem:[%s224_s19] sm:$0xf]  ;;  %vm283_vm0 = vcmask 130048   ;;  %v1256_v7 = vmov 4  }
  0x73   : > { %1029 = vset.pattern.permute.xlu0 %v1255_v2  ;;  %301 = vmatpush.msra.mxu0 %v282_v3  ;;  %v1257_v8 = vmov 5   ;;  %v1258_v9 = vmov 1   ;;  %v1259_v10 = vmov 7   ;;  %v1260_v11 = vmov 9   ;;  %s1269_s6 = smov 96   ;;  %s1270_s11 = smov 112  }
  0x74   : > { %336 = vperm.xlu2 %1032, %v280_v4   ;;  %326 = vperm.xlu1 %1031, %v280_v4   ;;  %v1261_v12 = vmov 6   ;;  %v1262_v13 = vmov 8   ;;  %v1263_v14 = vmov 13   ;;  %v1264_v15 = vmov 10   ;;  %s1271_s15 = smov 120   ;;  %s1272_s10 = smov 64  }
  0x75   : > { %309 = vperm.xlu0 %1029, %v280_v4   ;;  %302 = vmatpush.msra.mxu0 %v281_v5  ;;  %v1265_v16 = vmov 11   ;;  %v1266_v17 = vmov 14   ;;  %v1267_v18 = vmov 12   ;;  %v1268_v19 = vmov 15   ;;  %s1273_s14 = smov 88   ;;  %s1274_s8 = smov 104  }
  0x76   : > { %899 = vmatmul.msk.f32.vlgmr.msra.gmra.mxu0 %vm283_vm0, %v279_v6  ;;  %s1275_s16 = smov 32   ;;  %s1276_s22 = smov 56   ;;  %vm465_vm1 = vcmask 60416  }
  0x77   : > { %s1277_s13 = smov 80   ;;  %s1278_s2 = smov 24  }
  0x78   : > { %s1279_s26 = smov 72   ;;  %s1280_s9 = smov 48  }
  0x79   : > { %s1281_s7 = smov 40   ;;  %s1282_s19 = smov 16  }
  0x7a   : > { %s1283_s5 = smov 8   ;;  %s898_s30 = sshll.u32 %s1509_s18, 4 }
  0x7b   : > { %s1819_s27 = scalar_lea.vmem [#allocation10], %s898_s30  ;;  %s909_s28 = sshll.u32 %s1347_s25, 4 }
  0x7c   : > { %1033 = vset.pattern.permute.xlu2 %v1256_v7  ;;  %1034 = vset.pattern.permute.xlu1 %v1257_v8  ;;  %s753_s25 = scalar_lea.sflag [#allocation6], %s1509_s18 }
  0x7d   : > { %1030 = vset.pattern.permute.xlu0 %v1258_v9  ;;  %346 = vperm.xlu2 %1033, %v280_v4  }
  0x7e   : > { %356 = vperm.xlu1 %1034, %v280_v4   ;;  %316 = vperm.xlu0 %1030, %v280_v4  }
  0x85   : > { %1036 = vset.pattern.permute.xlu2 %v1259_v10 }
  0x86   : > { %1038 = vset.pattern.permute.xlu1 %v1260_v11  ;;  %1035 = vset.pattern.permute.xlu0 %v1261_v12 }
  0x87   : > { %376 = vperm.xlu2 %1036, %v280_v4   ;;  %396 = vperm.xlu1 %1038, %v280_v4  }
  0x88   : > { %366 = vperm.xlu0 %1035, %v280_v4  }
  0x8f   : > { %1037 = vset.pattern.permute.xlu2 %v1262_v13  ;;  %1042 = vset.pattern.permute.xlu1 %v1263_v14 }
  0x90   : > { %1039 = vset.pattern.permute.xlu0 %v1264_v15  ;;  %386 = vperm.xlu2 %1037, %v280_v4  }
  0x91   : > { %436 = vperm.xlu1 %1042, %v280_v4   ;;  %406 = vperm.xlu0 %1039, %v280_v4  }
  0x98   : > { %1040 = vset.pattern.permute.xlu2 %v1265_v16 }
  0x99   : > { %1043 = vset.pattern.permute.xlu0 %v1266_v17  ;;  %416 = vperm.xlu2 %1040, %v280_v4  }
  0x9a   : > { %446 = vperm.xlu0 %1043, %v280_v4  }
  0xa1   : > { %1041 = vset.pattern.permute.xlu2 %v1267_v18 }
  0xa2   : > { %426 = vperm.xlu2 %1041, %v280_v4   ;;  %1045 = vset.pattern.permute.xlu0 %v1268_v19 }
  0xaa   : > { %1044 = vset.pattern.permute.xlu2 %v1268_v19 }
  0xab   : > { %456 = vperm.xlu2 %1044, %v280_v4  }
  0xce   : > { %v1527_v20 = vpop.permute.xlu2 %336 }
  0xd7   : > { %v1529_v21 = vpop.permute.xlu2 %346 }
  0xe1   : > { %v1531_v22 = vpop.permute.xlu2 %376 }
  0xe6   : > { %v1533_v24 = vpop.permute.xlu1 %326 }
  0xe7   : > { %v310_v23 = vpop.permute.xlu0 %309 }
  0xea   : > { %v1535_v25 = vpop.permute.xlu2 %386 }
  0xf0   : > { %v1537_v26 = vpop.permute.xlu0 %316  ;;  %v1539_v27 = vpop.permute.xlu1 %356 }
  0xf3   : > { %v1541_v28 = vpop.permute.xlu2 %416  ;;  %v304_v29 = vpop.f32.mrf.mxu0 }
  0xf4   : > { %v1543_v30 = vperm.slane %v304_v29, 0  ;;  %v1545_v31 = vperm.slane %v304_v29, 2  ;;  %v1553_v35 = vperm.slane %v304_v29, 3  ;;  %v1560_v37 = vperm.slane %v304_v29, 1 }
  0xf6   : > { %v349_v32 = vmul.f32 %v1529_v21, %v1543_v30  ;;  %v329_v33 = vmul.f32 %v1533_v24, %v1543_v30  ;;  %v319_v34 = vmul.f32 %v1537_v26, %v1543_v30  ;;  %v1564_v38 = vmul.f32 %v1545_v31, %v1533_v24 }
  0xf7   : > { %v389_v40 = vmul.f32 %v1535_v25, %v1543_v30  ;;  %v1572_v41 = vmul.f32 %v1545_v31, %v1539_v27  ;;  %v1576_v42 = vmul.f32 %v1545_v31, %v1537_v26  ;;  %v1580_v43 = vmul.f32 %v1553_v35, %v1537_v26 }
  0xf8   : > { %351 = vrot.lane.b32.xlu0 %v349_v32, %s1269_s6  ;;  %331 = vrot.lane.b32.xlu2 %v329_v33, %s1270_s11  ;;  %v359_v45 = vmul.f32 %v1539_v27, %v1543_v30  ;;  %v1586_v46 = vmul.f32 %v1545_v31, %v1529_v21  ;;  %v1590_v47 = vmul.f32 %v1553_v35, %v1529_v21 }
  0xf9   : > { %321 = vrot.lane.b32.xlu1 %v319_v34, %s1271_s15  ;;  %v1566_v39 = vpop.permute.xlu1 %396  ;;  %v1594_v48 = vmul.f32 %v1545_v31, %v1531_v22  ;;  %v339_v49 = vmul.f32 %v1527_v20, %v1543_v30  ;;  %v1603_v51 = vmul.f32 %v1553_v35, %v1531_v22  ;;  %v1607_v52 = vmul.f32 %v1553_v35, %v1527_v20 }
  0xfa   : > { %v1557_v36 = vpop.permute.xlu0 %366  ;;  %v1611_v53 = vmul.f32 %v1545_v31, %v1566_v39  ;;  %v1619_v55 = vmul.f32 %v1545_v31, %v1527_v20  ;;  %v1623_v56 = vmul.f32 %v1553_v35, %v1535_v25  ;;  %v1630_v58 = vmul.f32 %v1543_v30, %v310_v23 }
  0xfb   : > { %v1615_v54 = vmul.f32 %v1553_v35, %v1557_v36  ;;  %v1627_v57 = vmul.f32 %v1545_v31, %v1557_v36  ;;  %v1637_v60 = vmul.f32 %v1553_v35, %v1533_v24  ;;  %v1642_v61 = vmul.f32 %v1560_v37, %v310_v23 }
  0xfc   : > { %v427_v44 = vpop.permute.xlu2 %426  ;;  %v1646_v62 = vmul.f32 %v1553_v35, %v1541_v28  ;;  %v1650_v63 = vmul.f32 %v1553_v35, %v1539_v27  ;;  %v1655_v0 = vmul.f32 %v1545_v31, %v1535_v25  ;;  %v1659_v1 = vmul.f32 %v1553_v35, %v1566_v39 }
  0xfd   : > { %v1599_v50 = vmul.f32 %v1560_v37, %v427_v44  ;;  %v1633_v59 = vmul.f32 %v1545_v31, %v427_v44  ;;  %v1663_v2 = vmul.f32 %v1545_v31, %v1541_v28  ;;  %v1666_v3 = vmul.f32 %v1553_v35, %v427_v44 }
  0xfe   : > { %v1669_v4 = vmul.f32 %v1545_v31, %v310_v23  ;;  %v1672_v5 = vmul.f32 %v1553_v35, %v310_v23  ;;  %v429_v9 = vmul.f32 %v427_v44, %v1543_v30  ;;  %v399_v10 = vmul.f32 %v1566_v39, %v1543_v30 }
  0xff   : > { %v369_v11 = vmul.f32 %v1557_v36, %v1543_v30  ;;  %v476_v13 = vmul.f32 %v1560_v37, %v1533_v24  ;;  %v379_v15 = vmul.f32 %v1531_v22, %v1543_v30  ;;  %v494_v16 = vmul.f32 %v1560_v37, %v1539_v27 }
 0x100   : > { %391 = vrot.lane.b32.xlu0 %v389_v40, %s1272_s10  ;;  %361 = vrot.lane.b32.xlu2 %v359_v45, %s1273_s14  ;;  %v470_v17 = vmul.f32 %v1560_v37, %v1537_v26  ;;  %v512_v19 = vmul.f32 %v1560_v37, %v1535_v25  ;;  %v488_v23 = vmul.f32 %v1560_v37, %v1529_v21 }
 0x101   : > { %341 = vrot.lane.b32.xlu1 %v339_v49, %s1274_s8  ;;  %v419_v24 = vmul.f32 %v1541_v28, %v1543_v30  ;;  %v530_v27 = vmul.f32 %v1560_v37, %v1541_v28  ;;  %v506_v25 = vmul.f32 %v1560_v37, %v1531_v22  ;;  %v482_v34 = vmul.f32 %v1560_v37, %v1527_v20 }
 0x102   : > { %v518_v20 = vmul.f32 %v1560_v37, %v1566_v39 }
 0x103   : > { %v407_v6 = vpop.permute.xlu0 %406  ;;  %v1688_v12 = vpop.permute.xlu1 %436 }
 0x104   : > { %v1675_v7 = vmul.f32 %v1553_v35, %v407_v6  ;;  %v1678_v8 = vmul.f32 %v1545_v31, %v407_v6  ;;  %v439_v14 = vmul.f32 %v1688_v12, %v1543_v30  ;;  %v409_v18 = vmul.f32 %v407_v6, %v1543_v30 }
 0x105   : > { %v1727_v29 = vpop.permute.xlu2 %456  ;;  %v524_v28 = vmul.f32 %v1560_v37, %v407_v6  ;;  %v542_v33 = vmul.f32 %v1560_v37, %v1688_v12  ;;  %v637_v49 = vmul.f32 %v1545_v31, %v1688_v12 }
 0x106   : > { %v459_v22 = vmul.f32 %v1727_v29, %v1543_v30 }
 0x108   : > { %431 = vrot.lane.b32.xlu0 %v429_v9, %s1275_s16  ;;  %401 = vrot.lane.b32.xlu2 %v399_v10, %s1276_s22 }
 0x109   : > { %371 = vrot.lane.b32.xlu1 %v369_v11, %s1277_s13 }
 0x10c   : > { %v1716_v26 = vpop.permute.xlu0 %446 }
 0x10d   : > { %v449_v21 = vmul.f32 %v1716_v26, %v1543_v30  ;;  %v548_v32 = vmul.f32 %v1560_v37, %v1716_v26  ;;  %v500_v30 = vmul.f32 %v1560_v37, %v1557_v36  ;;  %v554_v36 = vmul.f32 %v1560_v37, %v1727_v29 }
 0x110   : > { %478 = vrot.lane.b32.xlu0 %v476_v13, %s1270_s11  ;;  %441 = vrot.lane.b32.xlu2 %v439_v14, %s1278_s2  ;;  %v643_v13 = vmul.f32 %v1545_v31, %v1716_v26 }
 0x111   : > { %381 = vrot.lane.b32.xlu1 %v379_v15, %s1279_s26 }
 0x118   : > { %496 = vrot.lane.b32.xlu0 %v494_v16, %s1273_s14  ;;  %472 = vrot.lane.b32.xlu2 %v470_v17, %s1271_s15 }
 0x119   : > { %411 = vrot.lane.b32.xlu1 %v409_v18, %s1280_s9  ;;  %v744_v18 = vmul.f32 %v1553_v35, %v1727_v29 }
 0x120   : > { %514 = vrot.lane.b32.xlu0 %v512_v19, %s1272_s10  ;;  %490 = vrot.lane.b32.xlu2 %v488_v23, %s1269_s6 }
 0x121   : > { %421 = vrot.lane.b32.xlu1 %v419_v24, %s1281_s7 }
 0x128   : > { %532 = vrot.lane.b32.xlu0 %v530_v27, %s1281_s7  ;;  %508 = vrot.lane.b32.xlu2 %v506_v25, %s1279_s26 }
 0x129   : > { %451 = vrot.lane.b32.xlu1 %v449_v21, %s1282_s19 }
 0x130   : > { %550 = vrot.lane.b32.xlu0 %v548_v32, %s1282_s19  ;;  %526 = vrot.lane.b32.xlu2 %v524_v28, %s1280_s9 }
 0x131   : > { %461 = vrot.lane.b32.xlu1 %v459_v22, %s1283_s5 }
 0x138   : > { %573 = vrot.lane.b32.xlu0 %v1564_v38, %s1270_s11  ;;  %544 = vrot.lane.b32.xlu2 %v542_v33, %s1278_s2 }
 0x139   : > { %484 = vrot.lane.b32.xlu1 %v482_v34, %s1274_s8 }
 0x140   : > { %591 = vrot.lane.b32.xlu0 %v1572_v41, %s1273_s14  ;;  %567 = vrot.lane.b32.xlu2 %v1576_v42, %s1271_s15 }
 0x141   : > { %502 = vrot.lane.b32.xlu1 %v500_v30, %s1277_s13 }
 0x148   : > { %662 = vrot.lane.b32.xlu0 %v1580_v43, %s1271_s15  ;;  %585 = vrot.lane.b32.xlu2 %v1586_v46, %s1269_s6  ;;  %v732_v43 = vmul.f32 %v1553_v35, %v1688_v12 }
 0x149   : > { %520 = vrot.lane.b32.xlu1 %v518_v20, %s1276_s22 }
 0x150   : > { %680 = vrot.lane.b32.xlu0 %v1590_v47, %s1269_s6  ;;  %603 = vrot.lane.b32.xlu2 %v1594_v48, %s1279_s26  ;;  %v649_v48 = vmul.f32 %v1545_v31, %v1727_v29  ;;  %s764_s6 = scalar_lea.hbm %s1883_s4, %s909_s28 }
 0x151   : > { %538 = vrot.lane.b32.xlu1 %v1599_v50, %s1275_s16  ;;  %s767_s15 = sshll.u32 %s764_s6, 4  ;;  %s768_s15 = int_to_ptr.hbm [resolvable:$true] %s767_s15 }
 0x152   : > { %v332_v38 = vpop.permute.xlu2 %331 }
 0x158   : > { %698 = vrot.lane.b32.xlu0 %v1603_v51, %s1279_s26  ;;  %674 = vrot.lane.b32.xlu2 %v1607_v52, %s1274_s8 }
 0x159   : > { %556 = vrot.lane.b32.xlu1 %v554_v36, %s1283_s5 }
 0x15a   : > { %v362_v40 = vpop.permute.xlu2 %361 }
 0x160   : > { %615 = vrot.lane.b32.xlu0 %v1611_v53, %s1276_s22  ;;  %692 = vrot.lane.b32.xlu2 %v1615_v54, %s1277_s13 }
 0x161   : > { %579 = vrot.lane.b32.xlu1 %v1619_v55, %s1274_s8  ;;  %v738_v55 = vmul.f32 %v1553_v35, %v1716_v26 }
 0x162   : > { %v402_v44 = vpop.permute.xlu2 %401 }
 0x168   : > { %716 = vrot.lane.b32.xlu0 %v1675_v7, %s1280_s9  ;;  %704 = vrot.lane.b32.xlu2 %v1623_v56, %s1272_s10 }
 0x169   : > { %597 = vrot.lane.b32.xlu1 %v1627_v57, %s1277_s13  ;;  %s1168_s13 = scalar_lea.hbm %s1883_s4, 96 }
 0x16a   : > { %v352_v37 = vpop.permute.xlu0 %351  ;;  %v442_v52 = vpop.permute.xlu2 %441 }
 0x16b   : > { %v322_v39 = vpop.permute.xlu1 %321 }
 0x16c   : > { %v324_v45 = vadd.f32 %v322_v39, %v1630_v58 }
 0x16e   : > { %v334_v47 = vadd.f32 %v332_v38, %v324_v45 }
 0x170   : > { %633 = vrot.lane.b32.xlu0 %v1633_v59, %s1275_s16  ;;  %621 = vrot.lane.b32.xlu2 %v1678_v8, %s1280_s9 }
 0x171   : > { %668 = vrot.lane.b32.xlu1 %v1637_v60, %s1270_s11  ;;  %s765_s11 = sshll.u32 %s1819_s27, 4  ;;  %s766_s11 = int_to_ptr.vmem [resolvable:$true] %s765_s11 }
 0x172   : > { %v392_v42 = vpop.permute.xlu0 %391 }
 0x173   : > { %v342_v41 = vpop.permute.xlu1 %341 }
 0x174   : > { %v344_v51 = vadd.f32 %v342_v41, %v334_v47 }
 0x176   : > { %v354_v54 = vadd.f32 %v352_v37, %v344_v51 }
 0x178   : > { %734 = vrot.lane.b32.xlu0 %v732_v43, %s1278_s2  ;;  %722 = vrot.lane.b32.xlu2 %v1646_v62, %s1281_s7  ;;  %v364_v56 = vadd.f32 %v362_v40, %v354_v54  ;;  %v473_v62 = vpop.permute.xlu2 %472 }
 0x179   : > { %686 = vrot.lane.b32.xlu1 %v1650_v63, %s1273_s14  ;;  %v475_v31 = vadd.f32 %v473_v62, %v1642_v61  ;;  %s1162_s14 = sshra.s32 %s768_s15, 4  ;;  %s1163_s14 = int_to_ptr.hbm [resolvable:$true] %s1162_s14 }
 0x17a   : > { %v432_v50 = vpop.permute.xlu0 %431  ;;  %s1164_s8 = scalar_lea.hbm %s1163_s14, 16  ;;  %p1169_p6 = scmp.lt.s32.totalorder %s1163_s14, %s1883_s4 }
 0x17b   : > { %v372_v46 = vpop.permute.xlu1 %371  ;;  %p1165_p12 = scmp.ne.s32.totalorder %s1163_s14, %s1164_s8  ;;  %p1170_p1 = scmp.lt.s32.totalorder %s1168_s13, %s1164_s8 }
 0x17c   : > { %v374_v58 = vadd.f32 %v372_v46, %v364_v56 }
 0x17d   : > { %p1166_p3 = pnand %p1165_p12, %p1397_p13  ;;  %p1171_p10 = por %p1170_p1, %p1169_p6 }
 0x17f   : > { %p1167_p8 = pneg %p1166_p3 }
 0x180   : > { %651 = vrot.lane.b32.xlu0 %v649_v48, %s1283_s5  ;;  %639 = vrot.lane.b32.xlu2 %v637_v49, %s1278_s2  ;;  %v491_v9 = vpop.permute.xlu2 %490 }
 0x181   : > { %609 = vrot.lane.b32.xlu1 %v1655_v0, %s1272_s10  ;;  %p1172_p0 = pnand %p1171_p10, %p1167_p8 }
 0x182   : > { %v479_v57 = vpop.permute.xlu0 %478 }
 0x183   : > { %v382_v53 = vpop.permute.xlu1 %381  ;;  %v481_v19 = vadd.f32 %v479_v57, %v475_v31 }
 0x184   : > { %v384_v60 = vadd.f32 %v382_v53, %v374_v58 }
 0x186   : > { %v394_v63 = vadd.f32 %v392_v42, %v384_v60 }
 0x188   : > { %740 = vrot.lane.b32.xlu2 %v738_v55, %s1282_s19  ;;  %v404_v7 = vadd.f32 %v402_v44, %v394_v63  ;;  %v509_v15 = vpop.permute.xlu2 %508 }
 0x189   : > { %710 = vrot.lane.b32.xlu1 %v1659_v1, %s1276_s22 }
 0x18a   : > { %v497_v0 = vpop.permute.xlu0 %496 }
 0x18b   : > { %v412_v59 = vpop.permute.xlu1 %411 }
 0x18c   : > { %v414_v8 = vadd.f32 %v412_v59, %v404_v7 }
 0x190   : > { %v527_v23 = vpop.permute.xlu2 %526 }
 0x191   : > { %627 = vrot.lane.b32.xlu1 %v1663_v2, %s1281_s7 }
 0x192   : > { %v515_v12 = vpop.permute.xlu0 %514 }
 0x193   : > { %v422_v6 = vpop.permute.xlu1 %421 }
 0x194   : > { %v424_v10 = vadd.f32 %v422_v6, %v414_v8 }
 0x196   : > { %v434_v1 = vadd.f32 %v432_v50, %v424_v10 }
 0x198   : > { %v444_v14 = vadd.f32 %v442_v52, %v434_v1  ;;  %v545_v22 = vpop.permute.xlu2 %544 }
 0x199   : > { %728 = vrot.lane.b32.xlu1 %v1666_v3, %s1275_s16 }
 0x19a   : > { %v533_v3 = vpop.permute.xlu0 %532 }
 0x19b   : > { %v452_v11 = vpop.permute.xlu1 %451 }
 0x19c   : > { %v454_v2 = vadd.f32 %v452_v11, %v444_v14 }
 0x1a0   : > { %v568_v61 = vpop.permute.xlu2 %567 }
 0x1a1   : > { %645 = vrot.lane.b32.xlu1 %v643_v13, %s1282_s19  ;;  %v570_v55 = vadd.f32 %v568_v61, %v1669_v4 }
 0x1a2   : > { %v551_v25 = vpop.permute.xlu0 %550 }
 0x1a3   : > { %v462_v16 = vpop.permute.xlu1 %461 }
 0x1a4   : > { %v464_v17 = vadd.f32 %v462_v16, %v454_v2 }
 0x1a6   : > { %466 = vst.msk [vmem:[%s1819_s27] sm:$0xf] %vm465_vm1, %v464_v17 }
 0x1a8   : > { %v586_v41 = vpop.permute.xlu2 %585 }
 0x1a9   : > { %746 = vrot.lane.b32.xlu1 %v744_v18, %s1283_s5 }
 0x1aa   : > { %v574_v30 = vpop.permute.xlu0 %573 }
 0x1ab   : > { %v485_v24 = vpop.permute.xlu1 %484  ;;  %v576_v57 = vadd.f32 %v574_v30, %v570_v55 }
 0x1ac   : > { %v487_v26 = vadd.f32 %v485_v24, %v481_v19 }
 0x1ae   : > { %v493_v27 = vadd.f32 %v491_v9, %v487_v26 }
 0x1b0   : > { %v499_v21 = vadd.f32 %v497_v0, %v493_v27  ;;  %v604_v46 = vpop.permute.xlu2 %603 }
 0x1b2   : > { %v592_v39 = vpop.permute.xlu0 %591 }
 0x1b3   : > { %v503_v32 = vpop.permute.xlu1 %502 }
 0x1b4   : > { %v505_v28 = vadd.f32 %v503_v32, %v499_v21 }
 0x1b6   : > { %v511_v33 = vadd.f32 %v509_v15, %v505_v28 }
 0x1b8   : > { %v517_v34 = vadd.f32 %v515_v12, %v511_v33  ;;  %v675_v50 = vpop.permute.xlu2 %674 }
 0x1ba   : > { %v663_v45 = vpop.permute.xlu0 %662 }
 0x1bb   : > { %v521_v20 = vpop.permute.xlu1 %520  ;;  %v665_v58 = vadd.f32 %v663_v45, %v1672_v5 }
 0x1bc   : > { %v523_v35 = vadd.f32 %v521_v20, %v517_v34 }
 0x1be   : > { %v529_v29 = vadd.f32 %v527_v23, %v523_v35 }
 0x1c0   : > { %v535_v36 = vadd.f32 %v533_v3, %v529_v29  ;;  %v693_v53 = vpop.permute.xlu2 %692 }
 0x1c2   : > { %v681_v48 = vpop.permute.xlu0 %680 }
 0x1c3   : > { %v539_v38 = vpop.permute.xlu1 %538 }
 0x1c4   : > { %v541_v37 = vadd.f32 %v539_v38, %v535_v36 }
 0x1c6   : > { %v547_v40 = vadd.f32 %v545_v22, %v541_v37 }
 0x1c8   : > { %v553_v42 = vadd.f32 %v551_v25, %v547_v40  ;;  %v705_v62 = vpop.permute.xlu2 %704 }
 0x1ca   : > { %v699_v51 = vpop.permute.xlu0 %698 }
 0x1cb   : > { %v557_v43 = vpop.permute.xlu1 %556 }
 0x1cc   : > { %v559_v44 = vadd.f32 %v557_v43, %v553_v42 }
 0x1ce   : > { %900 = vst.msk [vmem:[%s1819_s27 + $0x4] sm:$0xf] %vm465_vm1, %v559_v44 }
 0x1d0   : > { %v622_v1 = vpop.permute.xlu2 %621 }
 0x1d2   : > { %v616_v56 = vpop.permute.xlu0 %615 }
 0x1d3   : > { %v580_v47 = vpop.permute.xlu1 %579 }
 0x1d4   : > { %v582_v59 = vadd.f32 %v580_v47, %v576_v57 }
 0x1d6   : > { %v588_v0 = vadd.f32 %v586_v41, %v582_v59 }
 0x1d8   : > { %v594_v8 = vadd.f32 %v592_v39, %v588_v0  ;;  %v723_v17 = vpop.permute.xlu2 %722 }
 0x1da   : > { %v717_v7 = vpop.permute.xlu0 %716 }
 0x1db   : > { %v598_v49 = vpop.permute.xlu1 %597 }
 0x1dc   : > { %v600_v10 = vadd.f32 %v598_v49, %v594_v8 }
 0x1de   : > { %v606_v14 = vadd.f32 %v604_v46, %v600_v10 }
 0x1e0   : > { %v640_v25 = vpop.permute.xlu2 %639 }
 0x1e2   : > { %v634_v15 = vpop.permute.xlu0 %633 }
 0x1e3   : > { %v669_v52 = vpop.permute.xlu1 %668 }
 0x1e4   : > { %v671_v60 = vadd.f32 %v669_v52, %v665_v58 }
 0x1e6   : > { %v677_v6 = vadd.f32 %v675_v50, %v671_v60 }
 0x1e8   : > { %v683_v9 = vadd.f32 %v681_v48, %v677_v6  ;;  %v741_v35 = vpop.permute.xlu2 %740 }
 0x1ea   : > { %v735_v23 = vpop.permute.xlu0 %734 }
 0x1eb   : > { %v687_v54 = vpop.permute.xlu1 %686 }
 0x1ec   : > { %v689_v11 = vadd.f32 %v687_v54, %v683_v9 }
 0x1ee   : > { %v695_v13 = vadd.f32 %v693_v53, %v689_v11 }
 0x1f0   : > { %v701_v2 = vadd.f32 %v699_v51, %v695_v13 }
 0x1f2   : > { %v707_v3 = vadd.f32 %v705_v62, %v701_v2  ;;  %v652_v34 = vpop.permute.xlu0 %651 }
 0x1f3   : > { %v610_v63 = vpop.permute.xlu1 %609 }
 0x1f4   : > { %v612_v4 = vadd.f32 %v610_v63, %v606_v14 }
 0x1f6   : > { %v618_v5 = vadd.f32 %v616_v56, %v612_v4 }
 0x1f8   : > { %v624_v31 = vadd.f32 %v622_v1, %v618_v5 }
 0x1fb   : > { %v711_v12 = vpop.permute.xlu1 %710 }
 0x1fc   : > { %v713_v18 = vadd.f32 %v711_v12, %v707_v3 }
 0x1fe   : > { %v719_v26 = vadd.f32 %v717_v7, %v713_v18 }
 0x200   : > { %v725_v21 = vadd.f32 %v723_v17, %v719_v26 }
 0x203   : > { %v628_v16 = vpop.permute.xlu1 %627 }
 0x204   : > { %v630_v19 = vadd.f32 %v628_v16, %v624_v31 }
 0x206   : > { %v636_v27 = vadd.f32 %v634_v15, %v630_v19 }
 0x208   : > { %v642_v28 = vadd.f32 %v640_v25, %v636_v27 }
 0x20b   : > { %v729_v24 = vpop.permute.xlu1 %728 }
 0x20c   : > { %v731_v32 = vadd.f32 %v729_v24, %v725_v21 }
 0x20e   : > { %v737_v30 = vadd.f32 %v735_v23, %v731_v32 }
 0x210   : > { %v743_v29 = vadd.f32 %v741_v35, %v737_v30 }
 0x213   : > { %v646_v22 = vpop.permute.xlu1 %645 }
 0x214   : > { %v648_v33 = vadd.f32 %v646_v22, %v642_v28 }
 0x216   : > { %v654_v20 = vadd.f32 %v652_v34, %v648_v33 }
 0x218   : > { %901 = vst.msk [vmem:[%s1819_s27 + $0x8] sm:$0xf] %vm465_vm1, %v654_v20 }
 0x21b   : > { %v747_v61 = vpop.permute.xlu1 %746 }
 0x21c   : > { %v749_v36 = vadd.f32 %v747_v61, %v743_v29 }
 0x21e   : > { %902 = vst.msk [vmem:[%s1819_s27 + $0xc] sm:$0xf] %vm465_vm1, %v749_v36 }
 0x21f   : > { %1175 = shalt.err (!%p1172_p0)
}
 0x220   : > { %s1284_s18 = smov 4  }
 0x221   : > { %918 = dma.vmem_to_hbm [thread:$0]  (%p1397_p13), %s766_s11, 256, %s768_s15, %s753_s25, %s1272_s10, %s1272_s10, %s1284_s18  }
 0x222 PF: > { %s1911_s9 = sld [smem:[#allocation18_spill]]  ;;  %p937_p9 = scmp.ge.s32.totalorder %s1248_s24, 2 }
 0x223   : > { %s1912_s7 = sld [smem:[#allocation21_spill]] }
 0x228   : > { %s782_s19 = sand.u32 1, %s1911_s9  }
 0x229   : > { %p1913_p11 = scmp.ne.s32.totalorder %s1912_s7, 0  ;;  %s783_s5 = scalar_lea.sflag [#allocation6], %s782_s19 }
 0x22b   : > { %p933_p2 = pnand %p937_p9, %p1913_p11 }
 0x22d   : > { %p934_p5 = pneg %p933_p2 }
 0x22f   : > { %1219 = dma.done.wait (%p934_p5), %s783_s5, 256  }
 0x230   : > { %1221 = vsyncadd (%p934_p5), %s783_s5, 4294967040  ;;  %s1914_s24 = sld [smem:[#allocation19_spill]]  ;;  %s1917_s19 = smov %s1228_s20 }
 0x231   : > { %s1915_s30 = sld [smem:[#allocation22_spill]]  ;;  %s1918_s20 = smov %s1232_s21 }
 0x232   : > { %s1916_s12 = sld [smem:[#allocation20_spill]]  ;;  %s1920_s22 = smov %s1240_s0 }
 0x233   : > { %s1921_s0 = smov %s1244_s23 }
 0x236   : > { %p28_p13 = scmp.ge.s32.totalorder %s1914_s24, 8  }
 0x237   : > { %s1919_s21 = smov %s1915_s30 }
 0x238   : > { %s1922_s23 = smov %s1916_s12  ;;  %30 = sbr.rel (!%p28_p13) target bundleno = 15 (0xf), region = 104 }
 0x23d   :  { %789 = vsyncpa [#allocation5], 1 }
 0x23e   :  { %791 = vsyncpa [#allocation5 + $0x1], 1 }
 0x23f   :  { %792 = vsyncpa [#allocation8], 1 }
 0x240   :  { %794 = vsyncpa [#allocation8 + $0x1], 1 }
 0x241   :  { %795 = vsyncpa [#allocation6], 1 }
 0x242   :  { %797 = vsyncpa [#allocation6 + $0x1], 1 }

</bundles_post_ra>
